<compile_context>
chip_gen: v7x
topology: tpu7x:2x2x1
jax: 0.10.0
libtpu: 0.0.40
codegen_flags: <defaults>
</compile_context>

<pallas_src>
import functools

import jax
import jax.numpy as jnp
from jax.experimental import pallas as pl
from jax.experimental.pallas import tpu as pltpu

BN_EPS = 1e-5


def _fused_part_embed_kernel(f1_ref, f2_ref, gamma_ref, beta_ref, w_ref, b_ref,
                             out_ref, *, inv_batch):
    # f1_ref/f2_ref: (B, D_total) full slabs; params are flattened/block-diagonal.
    x1 = f1_ref[...].astype(jnp.float32)
    x2 = f2_ref[...].astype(jnp.float32)
    d = x1 - x2
    x = d * d                                              # 'square' nonlinearity

    # Single-pass batch statistics (biased variance, as in BN training mode).
    s1 = jnp.sum(x, axis=0, keepdims=True)                 # (1, D_total)
    s2 = jnp.sum(x * x, axis=0, keepdims=True)             # (1, D_total)
    mean = s1 * inv_batch
    var = jnp.maximum(s2 * inv_batch - mean * mean, 0.0)   # guard tiny negatives

    # Fold BN into per-feature scale/shift; push the shift into the bias.
    scale = gamma_ref[...] * jax.lax.rsqrt(var + BN_EPS)   # (1, D_total)
    shift = beta_ref[...] - mean * scale                   # (1, D_total)

    w = w_ref[...]                                         # (D_total, C_total)
    logits = jnp.dot(x * scale, w, preferred_element_type=jnp.float32)   # (B, C_total)
    logits = logits + (jnp.dot(shift, w, preferred_element_type=jnp.float32)
                       + b_ref[...])                       # (1, C_total) broadcast
    out_ref[...] = logits.astype(out_ref.dtype)


@functools.partial(jax.jit, static_argnames=("num_parts", "part_dims"))
def part_siamese_forward(f1, f2, gamma, beta, w, b, *, num_parts, part_dims):
    B = f1.shape[0]
    num_class = w.shape[-1]
    d_total = num_parts * part_dims
    c_total = num_parts * num_class

    # Flatten per-part BN params along the feature (lane) axis; build the
    # block-diagonal weight so all parts become one matmul.
    gamma_flat = gamma.reshape(1, d_total)
    beta_flat = beta.reshape(1, d_total)
    eye = jnp.eye(num_parts, dtype=w.dtype)
    w_bd = jnp.einsum("pdc,pq->pdqc", w, eye).reshape(d_total, c_total)
    b_flat = b.reshape(1, c_total)

    kernel = functools.partial(_fused_part_embed_kernel, inv_batch=1.0 / B)

    out = pl.pallas_call(
        kernel,
        out_shape=jax.ShapeDtypeStruct((B, c_total), jnp.float32),
        grid=(1,),
        in_specs=[
            pl.BlockSpec((B, d_total), lambda i: (0, 0)),        # f1 slab
            pl.BlockSpec((B, d_total), lambda i: (0, 0)),        # f2 slab
            pl.BlockSpec((1, d_total), lambda i: (0, 0)),        # bn gamma
            pl.BlockSpec((1, d_total), lambda i: (0, 0)),        # bn beta
            pl.BlockSpec((d_total, c_total), lambda i: (0, 0)),  # block-diag W
            pl.BlockSpec((1, c_total), lambda i: (0, 0)),        # bias
        ],
        out_specs=pl.BlockSpec((B, c_total), lambda i: (0, 0)),
        compiler_params=pltpu.CompilerParams(
            dimension_semantics=("arbitrary",)),
    )(f1, f2, gamma_flat, beta_flat, w_bd, b_flat)

    # Match the PyTorch module: a list of per-part logits.
    return [out[:, p * num_class:(p + 1) * num_class] for p in range(num_parts)]


def _reference_forward(f1, f2, gamma, beta, w, b, num_parts, part_dims):
    outs = []
    for p in range(num_parts):
        x1 = f1[:, p * part_dims:(p + 1) * part_dims].astype(jnp.float32)
        x2 = f2[:, p * part_dims:(p + 1) * part_dims].astype(jnp.float32)
        x = (x1 - x2) ** 2
        mean = jnp.mean(x, axis=0, keepdims=True)
        var = jnp.mean((x - mean) ** 2, axis=0, keepdims=True)
        xn = (x - mean) / jnp.sqrt(var + BN_EPS)
        xn = xn * gamma[p] + beta[p]
        outs.append(xn @ w[p] + b[p])
    return outs


if __name__ == "__main__":
    # Small shapes consistent with the module defaults.
    B = 8
    num_parts = 6
    part_dims = 256
    num_class = 2

    key = jax.random.PRNGKey(0)
    k1, k2, kw = jax.random.split(key, 3)

    f1 = jax.random.normal(k1, (B, num_parts * part_dims), jnp.float32)
    f2 = jax.random.normal(k2, (B, num_parts * part_dims), jnp.float32)

    # Deterministic parameter init mirroring the module's __init__:
    #   BatchNorm1d: weight=1, bias=0; Linear: weight ~ N(0, 0.001), bias=0.
    gamma = jnp.ones((num_parts, 1, part_dims), jnp.float32)
    beta = jnp.zeros((num_parts, 1, part_dims), jnp.float32)
    w = 0.001 * jax.random.normal(kw, (num_parts, part_dims, num_class), jnp.float32)
    b = jnp.zeros((num_parts, 1, num_class), jnp.float32)

    logits = part_siamese_forward(
        f1, f2, gamma, beta, w, b, num_parts=num_parts, part_dims=part_dims)
    logits = [jax.block_until_ready(l) for l in logits]

    ref = _reference_forward(f1, f2, gamma, beta, w, b, num_parts, part_dims)
    for p in range(num_parts):
        assert logits[p].shape == (B, num_class)
        assert jnp.allclose(logits[p], ref[p], atol=1e-4, rtol=1e-4), f"part {p} mismatch"

    print("KERNEL_OK")
</pallas_src>

<mosaic_0001>
module attributes {stable_mosaic.version = 11 : i64} {
  func.func @_fused_part_embed_kernel(%arg0: i32, %arg1: memref<8x1536xf32, #tpu.memory_space<vmem>>, %arg2: memref<8x1536xf32, #tpu.memory_space<vmem>>, %arg3: memref<1x1536xf32, #tpu.memory_space<vmem>>, %arg4: memref<1x1536xf32, #tpu.memory_space<vmem>>, %arg5: memref<1536x12xf32, #tpu.memory_space<vmem>>, %arg6: memref<1x12xf32, #tpu.memory_space<vmem>>, %arg7: memref<8x12xf32, #tpu.memory_space<vmem>>) attributes {dimension_semantics = [#tpu.dimension_semantics<arbitrary>], iteration_bounds = array<i64: 1>, scalar_prefetch = 0 : i64, scratch_operands = 0 : i64, tpu.core_type = #tpu.core_type<tc>, window_params = [{pipeline_mode = #tpu.pipeline_mode<synchronous>, transform_indices = @transform_0, window_bounds = array<i64: 8, 1536>}, {pipeline_mode = #tpu.pipeline_mode<synchronous>, transform_indices = @transform_1, window_bounds = array<i64: 8, 1536>}, {pipeline_mode = #tpu.pipeline_mode<synchronous>, transform_indices = @transform_2, window_bounds = array<i64: 1, 1536>}, {pipeline_mode = #tpu.pipeline_mode<synchronous>, transform_indices = @transform_3, window_bounds = array<i64: 1, 1536>}, {pipeline_mode = #tpu.pipeline_mode<synchronous>, transform_indices = @transform_4, window_bounds = array<i64: 1536, 12>}, {pipeline_mode = #tpu.pipeline_mode<synchronous>, transform_indices = @transform_5, window_bounds = array<i64: 1, 12>}, {pipeline_mode = #tpu.pipeline_mode<synchronous>, transform_indices = @transform_6, window_bounds = array<i64: 8, 12>}]} {
    %c0 = arith.constant 0 : index
    %c0_0 = arith.constant 0 : index
    %0 = vector.load %arg1[%c0, %c0_0] : memref<8x1536xf32, #tpu.memory_space<vmem>>, vector<8x1536xf32>
    %c0_1 = arith.constant 0 : index
    %c0_2 = arith.constant 0 : index
    %1 = vector.load %arg2[%c0_1, %c0_2] : memref<8x1536xf32, #tpu.memory_space<vmem>>, vector<8x1536xf32>
    %2 = arith.subf %0, %1 : vector<8x1536xf32>
    %3 = arith.mulf %2, %2 : vector<8x1536xf32>
    %cst = arith.constant dense<0.000000e+00> : vector<1536xf32>
    %4 = vector.multi_reduction <add>, %3, %cst [0] : vector<8x1536xf32> to vector<1536xf32>
    %5 = vector.shape_cast %4 : vector<1536xf32> to vector<1x1536xf32>
    %6 = arith.mulf %3, %3 : vector<8x1536xf32>
    %cst_3 = arith.constant dense<0.000000e+00> : vector<1536xf32>
    %7 = vector.multi_reduction <add>, %6, %cst_3 [0] : vector<8x1536xf32> to vector<1536xf32>
    %8 = vector.shape_cast %7 : vector<1536xf32> to vector<1x1536xf32>
    %cst_4 = arith.constant 1.250000e-01 : f32
    %9 = vector.broadcast %cst_4 : f32 to vector<1x1536xf32>
    %10 = arith.mulf %5, %9 : vector<1x1536xf32>
    %cst_5 = arith.constant 1.250000e-01 : f32
    %11 = vector.broadcast %cst_5 : f32 to vector<1x1536xf32>
    %12 = arith.mulf %8, %11 : vector<1x1536xf32>
    %13 = arith.mulf %10, %10 : vector<1x1536xf32>
    %14 = arith.subf %12, %13 : vector<1x1536xf32>
    %cst_6 = arith.constant 0.000000e+00 : f32
    %15 = vector.broadcast %cst_6 : f32 to vector<1x1536xf32>
    %16 = arith.maximumf %14, %15 : vector<1x1536xf32>
    %c0_7 = arith.constant 0 : index
    %c0_8 = arith.constant 0 : index
    %17 = vector.load %arg3[%c0_7, %c0_8] : memref<1x1536xf32, #tpu.memory_space<vmem>>, vector<1x1536xf32>
    %cst_9 = arith.constant 9.99999974E-6 : f32
    %18 = vector.broadcast %cst_9 : f32 to vector<1x1536xf32>
    %19 = arith.addf %16, %18 : vector<1x1536xf32>
    %20 = math.rsqrt %19 : vector<1x1536xf32>
    %21 = arith.mulf %17, %20 : vector<1x1536xf32>
    %c0_10 = arith.constant 0 : index
    %c0_11 = arith.constant 0 : index
    %22 = vector.load %arg4[%c0_10, %c0_11] : memref<1x1536xf32, #tpu.memory_space<vmem>>, vector<1x1536xf32>
    %23 = arith.mulf %10, %21 : vector<1x1536xf32>
    %24 = arith.subf %22, %23 : vector<1x1536xf32>
    %c0_12 = arith.constant 0 : index
    %c0_13 = arith.constant 0 : index
    %25 = vector.load %arg5[%c0_12, %c0_13] : memref<1536x12xf32, #tpu.memory_space<vmem>>, vector<1536x12xf32>
    %26 = vector.broadcast %21 : vector<1x1536xf32> to vector<8x1536xf32>
    %27 = arith.mulf %3, %26 : vector<8x1536xf32>
    %cst_14 = arith.constant dense<0.000000e+00> : vector<8x12xf32>
    %28 = tpu.matmul %27, %25, %cst_14 {dimension_numbers = #tpu.dot_dimension_numbers<[1], [0], [0], [1], [0, 0, 1, 1], [], []>} : vector<8x1536xf32>, vector<1536x12xf32>, vector<8x12xf32> -> vector<8x12xf32>
    %cst_15 = arith.constant dense<0.000000e+00> : vector<1x12xf32>
    %29 = tpu.matmul %24, %25, %cst_15 {dimension_numbers = #tpu.dot_dimension_numbers<[1], [0], [0], [1], [0, 0, 1, 1], [], []>} : vector<1x1536xf32>, vector<1536x12xf32>, vector<1x12xf32> -> vector<1x12xf32>
    %c0_16 = arith.constant 0 : index
    %c0_17 = arith.constant 0 : index
    %30 = vector.load %arg6[%c0_16, %c0_17] : memref<1x12xf32, #tpu.memory_space<vmem>>, vector<1x12xf32>
    %31 = arith.addf %29, %30 : vector<1x12xf32>
    %32 = vector.broadcast %31 : vector<1x12xf32> to vector<8x12xf32>
    %33 = arith.addf %28, %32 : vector<8x12xf32>
    %c0_18 = arith.constant 0 : index
    %c0_19 = arith.constant 0 : index
    %34 = vector.load %arg7[%c0_18, %c0_19] : memref<8x12xf32, #tpu.memory_space<vmem>>, vector<8x12xf32>
    tpu.vector_store %arg7[%c0_18, %c0_19], %33 {strides = array<i32>} : memref<8x12xf32, #tpu.memory_space<vmem>>, vector<8x12xf32>,
    return
  }
  func.func @transform_0(%arg0: i32) -> (i32, i32) {
    %c0_i32 = arith.constant 0 : i32
    %c0_i32_0 = arith.constant 0 : i32
    %c0_i32_1 = arith.constant 0 : i32
    return %c0_i32, %c0_i32_0 : i32, i32
  }
  func.func @transform_1(%arg0: i32) -> (i32, i32) {
    %c0_i32 = arith.constant 0 : i32
    %c0_i32_0 = arith.constant 0 : i32
    %c0_i32_1 = arith.constant 0 : i32
    return %c0_i32, %c0_i32_0 : i32, i32
  }
  func.func @transform_2(%arg0: i32) -> (i32, i32) {
    %c0_i32 = arith.constant 0 : i32
    %c0_i32_0 = arith.constant 0 : i32
    %c0_i32_1 = arith.constant 0 : i32
    return %c0_i32, %c0_i32_0 : i32, i32
  }
  func.func @transform_3(%arg0: i32) -> (i32, i32) {
    %c0_i32 = arith.constant 0 : i32
    %c0_i32_0 = arith.constant 0 : i32
    %c0_i32_1 = arith.constant 0 : i32
    return %c0_i32, %c0_i32_0 : i32, i32
  }
  func.func @transform_4(%arg0: i32) -> (i32, i32) {
    %c0_i32 = arith.constant 0 : i32
    %c0_i32_0 = arith.constant 0 : i32
    %c0_i32_1 = arith.constant 0 : i32
    return %c0_i32, %c0_i32_0 : i32, i32
  }
  func.func @transform_5(%arg0: i32) -> (i32, i32) {
    %c0_i32 = arith.constant 0 : i32
    %c0_i32_0 = arith.constant 0 : i32
    %c0_i32_1 = arith.constant 0 : i32
    return %c0_i32, %c0_i32_0 : i32, i32
  }
  func.func @transform_6(%arg0: i32) -> (i32, i32) {
    %c0_i32 = arith.constant 0 : i32
    %c0_i32_0 = arith.constant 0 : i32
    %c0_i32_1 = arith.constant 0 : i32
    return %c0_i32, %c0_i32_0 : i32, i32
  }
}

</mosaic_0001>

<bundles_post_ra>
// kernel: part_siamese_forward.1
= control target key start
LH: loop header
LB: loop body
LE: loop exit
PB: predicated region body
PF: predicated region fallthrough
CT: control target
= control target key end

     0   :  { %vm1678_vm0 = vcmask 97280   ;;  %s3911_s4 = inlined_call_operand.vmem [shape: f32[1536,12], index: 4, kind: input, shape index: {}]   ;;  %s3912_s0 = inlined_call_operand.vmem [shape: f32[8,1536], index: 0, kind: input, shape index: {}]   ;;  %s3913_s1 = inlined_call_operand.vmem [shape: f32[8,1536], index: 1, kind: input, shape index: {}]   ;;  %s3914_s2 = inlined_call_operand.vmem [shape: f32[1,1536], index: 2, kind: input, shape index: {}]   ;;  %s3915_s3 = inlined_call_operand.vmem [shape: f32[1,1536], index: 3, kind: input, shape index: {}]   ;;  %s3916_s5 = inlined_call_operand.vmem [shape: f32[1,12], index: 5, kind: input, shape index: {}]   ;;  %s3917_s6 = inlined_call_operand.vmem [shape: f32[8,12], index: 6, kind: output, shape index: {}]  }
   0x1   :  { %v583_v0 = vld [vmem:[%s3911_s4 + $0x80] sm:$0xff]  ;;  %v584_v1 = vld [vmem:[%s3911_s4 + $0x88] sm:$0xff]  ;;  %v585_v11 = vld [vmem:[%s3911_s4 + $0x90] sm:$0xff] }
   0x2   :  { %v567_v2 = vld [vmem:[%s3911_s4] sm:$0xff]  ;;  %v2558_v3 = vpack.c.bf16 %v584_v1, %v583_v0  ;;  %v568_v4 = vld [vmem:[%s3911_s4 + $0x8] sm:$0xff]  ;;  %v586_v13 = vld [vmem:[%s3911_s4 + $0x98] sm:$0xff] }
   0x3   :  { %v615_v5 = vld [vmem:[%s3911_s4 + $0x180] sm:$0xff]  ;;  %v616_v6 = vld [vmem:[%s3911_s4 + $0x188] sm:$0xff]  ;;  %v2569_v7 = vpack.c.bf16 %v568_v4, %v567_v2  ;;  %v569_v14 = vld [vmem:[%s3911_s4 + $0x10] sm:$0xff]  ;;  %v2596_v16 = vpack.c.bf16 %v586_v13, %v585_v11 }
   0x4   :  { %v2571_v8 = vpack.c.bf16 %v616_v6, %v615_v5  ;;  %v599_v9 = vld [vmem:[%s3911_s4 + $0x100] sm:$0xff]  ;;  %v600_v10 = vld [vmem:[%s3911_s4 + $0x108] sm:$0xff]  ;;  %2105 = vmatprep.subr.bf16.mxu0 %v2558_v3  ;;  %v570_v15 = vld [vmem:[%s3911_s4 + $0x18] sm:$0xff] }
   0x5   :  { %v2583_v12 = vpack.c.bf16 %v600_v10, %v599_v9  ;;  %2107 = vmatpush3.bf16.msra.mxu0 %v2569_v7  ;;  %v2598_v17 = vpack.c.bf16 %v570_v15, %v569_v14  ;;  %v617_v18 = vld [vmem:[%s3911_s4 + $0x190] sm:$0xff]  ;;  %v618_v19 = vld [vmem:[%s3911_s4 + $0x198] sm:$0xff]  ;;  %v587_v23 = vld [vmem:[%s3911_s4 + $0xa0] sm:$0xff] }
   0x6   :  { %2137 = vmatprep.subr.bf16.mxu1 %v2571_v8  ;;  %v601_v20 = vld [vmem:[%s3911_s4 + $0x110] sm:$0xff]  ;;  %v2610_v21 = vpack.c.bf16 %v618_v19, %v617_v18  ;;  %v602_v22 = vld [vmem:[%s3911_s4 + $0x118] sm:$0xff]  ;;  %v588_v24 = vld [vmem:[%s3911_s4 + $0xa8] sm:$0xff]  ;;  %2109 = vmatprep.subr.bf16.mxu0 %v2596_v16 }
   0x7   :  { %3987 = vst [vmem:[#allocation2_spill] sm:$0xff] %v2598_v17  ;;  %2139 = vmatpush3.bf16.msra.mxu1 %v2583_v12  ;;  %v2622_v25 = vpack.c.bf16 %v602_v22, %v601_v20  ;;  %v2624_v26 = vpack.c.bf16 %v588_v24, %v587_v23  ;;  %v571_v27 = vld [vmem:[%s3911_s4 + $0x20] sm:$0xff]  ;;  %v572_v28 = vld [vmem:[%s3911_s4 + $0x28] sm:$0xff]  ;;  %v589_v35 = vld [vmem:[%s3911_s4 + $0xb0] sm:$0xff] }
   0x8   :  { %v619_v29 = vld [vmem:[%s3911_s4 + $0x1a0] sm:$0xff]  ;;  %2141 = vmatprep.subr.bf16.mxu1 %v2610_v21  ;;  %v620_v30 = vld [vmem:[%s3911_s4 + $0x1a8] sm:$0xff]  ;;  %v2646_v33 = vpack.c.bf16 %v572_v28, %v571_v27  ;;  %v590_v36 = vld [vmem:[%s3911_s4 + $0xb8] sm:$0xff] }
   0x9   :  { %3988 = vst [vmem:[#allocation3_spill] sm:$0xff] %v2622_v25  ;;  %3989 = vst [vmem:[#allocation4_spill] sm:$0xff] %v2624_v26  ;;  %v603_v31 = vld [vmem:[%s3911_s4 + $0x120] sm:$0xff]  ;;  %v604_v32 = vld [vmem:[%s3911_s4 + $0x128] sm:$0xff]  ;;  %2111 = vmatpush3.bf16.msra.mxu0 %v2598_v17  ;;  %v2648_v34 = vpack.c.bf16 %v620_v30, %v619_v29  ;;  %v2663_v39 = vpack.c.bf16 %v590_v36, %v589_v35 }
   0xa   :  { %3990 = vst [vmem:[#allocation5_spill] sm:$0xff] %v2646_v33  ;;  %v573_v37 = vld [vmem:[%s3911_s4 + $0x30] sm:$0xff]  ;;  %2113 = vmatprep.subr.bf16.mxu0 %v2624_v26  ;;  %v2661_v38 = vpack.c.bf16 %v604_v32, %v603_v31  ;;  %v574_v40 = vld [vmem:[%s3911_s4 + $0x38] sm:$0xff]  ;;  %v591_v46 = vld [vmem:[%s3911_s4 + $0xc0] sm:$0xff] }
   0xb   :  { %3991 = vst [vmem:[#allocation6_spill] sm:$0xff] %v2648_v34  ;;  %2143 = vmatpush3.bf16.msra.mxu1 %v2622_v25  ;;  %3993 = vst [vmem:[#allocation8_spill] sm:$0xff] %v2663_v39  ;;  %v621_v41 = vld [vmem:[%s3911_s4 + $0x1b0] sm:$0xff]  ;;  %v622_v42 = vld [vmem:[%s3911_s4 + $0x1b8] sm:$0xff]  ;;  %v2690_v48 = vpack.c.bf16 %v574_v40, %v573_v37 }
   0xc   :  { %3992 = vst [vmem:[#allocation7_spill] sm:$0xff] %v2661_v38  ;;  %2145 = vmatprep.subr.bf16.mxu1 %v2648_v34  ;;  %v2675_v43 = vpack.c.bf16 %v622_v42, %v621_v41  ;;  %v605_v44 = vld [vmem:[%s3911_s4 + $0x130] sm:$0xff]  ;;  %v606_v45 = vld [vmem:[%s3911_s4 + $0x138] sm:$0xff]  ;;  %v592_v47 = vld [vmem:[%s3911_s4 + $0xc8] sm:$0xff] }
   0xd   :  { %2115 = vmatpush3.bf16.msra.mxu0 %v2646_v33  ;;  %3995 = vst [vmem:[#allocation10_spill] sm:$0xff] %v2690_v48  ;;  %v623_v49 = vld [vmem:[%s3911_s4 + $0x1c0] sm:$0xff]  ;;  %v624_v50 = vld [vmem:[%s3911_s4 + $0x1c8] sm:$0xff]  ;;  %v2700_v51 = vpack.c.bf16 %v606_v45, %v605_v44  ;;  %v2702_v52 = vpack.c.bf16 %v592_v47, %v591_v46  ;;  %v593_v58 = vld [vmem:[%s3911_s4 + $0xd0] sm:$0xff] }
   0xe   :  { %3994 = vst [vmem:[#allocation9_spill] sm:$0xff] %v2675_v43  ;;  %2117 = vmatprep.subr.bf16.mxu0 %v2663_v39  ;;  %v575_v53 = vld [vmem:[%s3911_s4 + $0x40] sm:$0xff]  ;;  %v576_v54 = vld [vmem:[%s3911_s4 + $0x48] sm:$0xff]  ;;  %v2714_v56 = vpack.c.bf16 %v624_v50, %v623_v49  ;;  %v594_v59 = vld [vmem:[%s3911_s4 + $0xd8] sm:$0xff] }
   0xf   :  { %2147 = vmatpush3.bf16.msra.mxu1 %v2661_v38  ;;  %3996 = vst [vmem:[#allocation11_spill] sm:$0xff] %v2700_v51  ;;  %3997 = vst [vmem:[#allocation12_spill] sm:$0xff] %v2702_v52  ;;  %v607_v55 = vld [vmem:[%s3911_s4 + $0x140] sm:$0xff]  ;;  %v608_v57 = vld [vmem:[%s3911_s4 + $0x148] sm:$0xff]  ;;  %v2732_v62 = vpack.c.bf16 %v576_v54, %v575_v53  ;;  %v2738_v0 = vpack.c.bf16 %v594_v59, %v593_v58 }
  0x10   :  { %2149 = vmatprep.subr.bf16.mxu1 %v2675_v43  ;;  %3998 = vst [vmem:[#allocation13_spill] sm:$0xff] %v2714_v56  ;;  %v625_v60 = vld [vmem:[%s3911_s4 + $0x1d0] sm:$0xff]  ;;  %v626_v61 = vld [vmem:[%s3911_s4 + $0x1d8] sm:$0xff]  ;;  %v2736_v63 = vpack.c.bf16 %v608_v57, %v607_v55  ;;  %v595_v9 = vld [vmem:[%s3911_s4 + $0xe0] sm:$0xff] }
  0x11   :  { %2119 = vmatpush3.bf16.msra.mxu0 %v2690_v48  ;;  %3999 = vst [vmem:[#allocation14_spill] sm:$0xff] %v2732_v62  ;;  %4001 = vst [vmem:[#allocation16_spill] sm:$0xff] %v2738_v0  ;;  %v577_v1 = vld [vmem:[%s3911_s4 + $0x50] sm:$0xff]  ;;  %v578_v2 = vld [vmem:[%s3911_s4 + $0x58] sm:$0xff]  ;;  %v2750_v5 = vpack.c.bf16 %v626_v61, %v625_v60 }
  0x12   :  { %2121 = vmatprep.subr.bf16.mxu0 %v2702_v52  ;;  %4000 = vst [vmem:[#allocation15_spill] sm:$0xff] %v2736_v63  ;;  %v609_v4 = vld [vmem:[%s3911_s4 + $0x150] sm:$0xff]  ;;  %v610_v6 = vld [vmem:[%s3911_s4 + $0x158] sm:$0xff]  ;;  %v596_v10 = vld [vmem:[%s3911_s4 + $0xe8] sm:$0xff]  ;;  %v2768_v14 = vpack.c.bf16 %v578_v2, %v577_v1 }
  0x13   :  { %2151 = vmatpush3.bf16.msra.mxu1 %v2700_v51  ;;  %4002 = vst [vmem:[#allocation17_spill] sm:$0xff] %v2750_v5  ;;  %v627_v11 = vld [vmem:[%s3911_s4 + $0x1e0] sm:$0xff]  ;;  %v628_v13 = vld [vmem:[%s3911_s4 + $0x1e8] sm:$0xff]  ;;  %v2781_v20 = vpack.c.bf16 %v610_v6, %v609_v4  ;;  %v2783_v22 = vpack.c.bf16 %v596_v10, %v595_v9  ;;  %v597_v24 = vld [vmem:[%s3911_s4 + $0xf0] sm:$0xff] }
  0x14   :  { %2153 = vmatprep.subr.bf16.mxu1 %v2714_v56  ;;  %4003 = vst [vmem:[#allocation18_spill] sm:$0xff] %v2768_v14  ;;  %v579_v15 = vld [vmem:[%s3911_s4 + $0x60] sm:$0xff]  ;;  %v580_v18 = vld [vmem:[%s3911_s4 + $0x68] sm:$0xff]  ;;  %v598_v27 = vld [vmem:[%s3911_s4 + $0xf8] sm:$0xff]  ;;  %v2795_v28 = vpack.c.bf16 %v628_v13, %v627_v11 }
  0x15   :  { %2123 = vmatpush3.bf16.msra.mxu0 %v2732_v62  ;;  %v611_v19 = vld [vmem:[%s3911_s4 + $0x160] sm:$0xff]  ;;  %4004 = vst [vmem:[#allocation19_spill] sm:$0xff] %v2781_v20  ;;  %4005 = vst [vmem:[#allocation20_spill] sm:$0xff] %v2783_v22  ;;  %v612_v23 = vld [vmem:[%s3911_s4 + $0x168] sm:$0xff]  ;;  %v2822_v41 = vpack.c.bf16 %v580_v18, %v579_v15  ;;  %v2843_v50 = vpack.c.bf16 %v598_v27, %v597_v24 }
  0x16   :  { %2125 = vmatprep.subr.bf16.mxu0 %v2738_v0  ;;  %4006 = vst [vmem:[#allocation21_spill] sm:$0xff] %v2795_v28  ;;  %v629_v29 = vld [vmem:[%s3911_s4 + $0x1f0] sm:$0xff]  ;;  %v630_v30 = vld [vmem:[%s3911_s4 + $0x1f8] sm:$0xff]  ;;  %v23_v31 = vld [vmem:[%s3912_s0] sm:$0xff]  ;;  %v2841_v49 = vpack.c.bf16 %v612_v23, %v611_v19 }
  0x17   :  { %2155 = vmatpush3.bf16.msra.mxu1 %v2736_v63  ;;  %v581_v32 = vld [vmem:[%s3911_s4 + $0x70] sm:$0xff]  ;;  %v582_v35 = vld [vmem:[%s3911_s4 + $0x78] sm:$0xff]  ;;  %v24_v36 = vld [vmem:[%s3912_s0 + $0x8] sm:$0xff]  ;;  %4007 = vst [vmem:[#allocation22_spill] sm:$0xff] %v2822_v41  ;;  %v2855_v57 = vpack.c.bf16 %v630_v30, %v629_v29 }
  0x18   :  { %2157 = vmatprep.subr.bf16.mxu1 %v2750_v5  ;;  %v25_v37 = vld [vmem:[%s3912_s0 + $0x10] sm:$0xff]  ;;  %v26_v40 = vld [vmem:[%s3912_s0 + $0x18] sm:$0xff]  ;;  %v27_v45 = vld [vmem:[%s3912_s0 + $0x20] sm:$0xff]  ;;  %4008 = vst [vmem:[#allocation23_spill] sm:$0xff] %v2841_v49  ;;  %v2876_v13 = vpack.c.bf16 %v582_v35, %v581_v32 }
  0x19   :  { %2127 = vmatpush3.bf16.msra.mxu0 %v2768_v14  ;;  %v613_v42 = vld [vmem:[%s3911_s4 + $0x170] sm:$0xff]  ;;  %v614_v44 = vld [vmem:[%s3911_s4 + $0x178] sm:$0xff]  ;;  %v28_v46 = vld [vmem:[%s3912_s0 + $0x28] sm:$0xff]  ;;  %4009 = vst [vmem:[#allocation24_spill] sm:$0xff] %v2843_v50 }
  0x1a   :  { %v29_v47 = vld [vmem:[%s3912_s0 + $0x30] sm:$0xff]  ;;  %2129 = vmatprep.subr.bf16.mxu0 %v2783_v22  ;;  %v30_v53 = vld [vmem:[%s3912_s0 + $0x38] sm:$0xff]  ;;  %v35_v54 = vld [vmem:[%s3913_s1] sm:$0xff]  ;;  %4010 = vst [vmem:[#allocation25_spill] sm:$0xff] %v2855_v57  ;;  %v2880_v23 = vpack.c.bf16 %v614_v44, %v613_v42 }
  0x1b   :  { %2159 = vmatpush3.bf16.msra.mxu1 %v2781_v20  ;;  %v36_v55 = vld [vmem:[%s3913_s1 + $0x8] sm:$0xff]  ;;  %v37_v58 = vld [vmem:[%s3913_s1 + $0x10] sm:$0xff]  ;;  %v38_v59 = vld [vmem:[%s3913_s1 + $0x18] sm:$0xff]  ;;  %v47_v61 = vsub.f32 %v23_v31, %v35_v54  ;;  %4011 = vst [vmem:[#allocation26_spill] sm:$0xff] %v2876_v13 }
  0x1c   :  { %2161 = vmatprep.subr.bf16.mxu1 %v2795_v28  ;;  %v39_v60 = vld [vmem:[%s3913_s1 + $0x20] sm:$0xff]  ;;  %v48_v1 = vsub.f32 %v24_v36, %v36_v55  ;;  %v40_v2 = vld [vmem:[%s3913_s1 + $0x28] sm:$0xff]  ;;  %v41_v4 = vld [vmem:[%s3913_s1 + $0x30] sm:$0xff]  ;;  %v49_v9 = vsub.f32 %v25_v37, %v37_v58  ;;  %v50_v10 = vsub.f32 %v26_v40, %v38_v59  ;;  %4012 = vst [vmem:[#allocation27_spill] sm:$0xff] %v2880_v23 }
  0x1d   :  { %v42_v6 = vld [vmem:[%s3913_s1 + $0x38] sm:$0xff]  ;;  %v51_v11 = vsub.f32 %v27_v45, %v39_v60  ;;  %2131 = vmatpush3.bf16.msra.mxu0 %v2822_v41  ;;  %v52_v15 = vsub.f32 %v28_v46, %v40_v2  ;;  %v53_v18 = vsub.f32 %v29_v47, %v41_v4  ;;  %v2882_v24 = vmul.f32 %v47_v61, %v47_v61  ;;  %v31_v45 = vld [vmem:[%s3912_s0 + $0x40] sm:$0xff]  ;;  %v32_v46 = vld [vmem:[%s3912_s0 + $0x48] sm:$0xff] }
  0x1e   :  { %v54_v19 = vsub.f32 %v30_v53, %v42_v6  ;;  %2133 = vmatprep.subr.bf16.mxu0 %v2843_v50  ;;  %v2885_v27 = vmul.f32 %v48_v1, %v48_v1  ;;  %v2887_v29 = vmul.f32 %v49_v9, %v49_v9  ;;  %v2889_v30 = vmul.f32 %v50_v10, %v50_v10  ;;  %v33_v58 = vld [vmem:[%s3912_s0 + $0x50] sm:$0xff]  ;;  %v34_v59 = vld [vmem:[%s3912_s0 + $0x58] sm:$0xff]  ;;  %v43_v60 = vld [vmem:[%s3913_s1 + $0x40] sm:$0xff] }
  0x1f   :  { %2163 = vmatpush3.bf16.msra.mxu1 %v2841_v49  ;;  %4013 = vst [vmem:[#allocation28_spill] sm:$0xff] %v2882_v24  ;;  %v2891_v31 = vmul.f32 %v51_v11, %v51_v11  ;;  %v2893_v32 = vmul.f32 %v52_v15, %v52_v15  ;;  %v2895_v35 = vmul.f32 %v53_v18, %v53_v18  ;;  %v71_v37 = vrot.slane %v2882_v24, 4  ;;  %v44_v6 = vld [vmem:[%s3913_s1 + $0x48] sm:$0xff]  ;;  %v45_v9 = vld [vmem:[%s3913_s1 + $0x50] sm:$0xff]  ;;  %v46_v10 = vld [vmem:[%s3913_s1 + $0x58] sm:$0xff] }
  0x20   :  { %2165 = vmatprep.subr.bf16.mxu1 %v2855_v57  ;;  %4014 = vst [vmem:[#allocation29_spill] sm:$0xff] %v2887_v29  ;;  %v2897_v36 = vmul.f32 %v54_v19, %v54_v19  ;;  %v77_v40 = vrot.slane %v2885_v27, 4  ;;  %v83_v42 = vrot.slane %v2887_v29, 4  ;;  %v89_v44 = vrot.slane %v2889_v30, 4 }
  0x21   :  { %4015 = vst [vmem:[#allocation30_spill] sm:$0xff] %v2891_v31  ;;  %4016 = vst [vmem:[#allocation31_spill] sm:$0xff] %v2893_v32  ;;  %2135 = vmatpush3.bf16.msra.mxu0 %v2876_v13  ;;  %v95_v47 = vrot.slane %v2891_v31, 4  ;;  %v101_v53 = vrot.slane %v2893_v32, 4  ;;  %v107_v54 = vrot.slane %v2895_v35, 4  ;;  %v72_v61 = vadd.f32 %v71_v37, %v2882_v24 }
  0x22   :  { %4017 = vst [vmem:[#allocation32_spill] sm:$0xff] %v2895_v35  ;;  %4018 = vst [vmem:[#allocation33_spill] sm:$0xff] %v2897_v36  ;;  %v113_v55 = vrot.slane %v2897_v36, 4  ;;  %v78_v1 = vadd.f32 %v77_v40, %v2885_v27  ;;  %v84_v2 = vadd.f32 %v83_v42, %v2887_v29  ;;  %v90_v4 = vadd.f32 %v89_v44, %v2889_v30 }
  0x23   :  { %2167 = vmatpush3.bf16.msra.mxu1 %v2880_v23  ;;  %v96_v11 = vadd.f32 %v95_v47, %v2891_v31  ;;  %v102_v15 = vadd.f32 %v101_v53, %v2893_v32  ;;  %v73_v18 = vrot.slane %v72_v61, 2  ;;  %v108_v37 = vadd.f32 %v107_v54, %v2895_v35 }
  0x24   :  { %v79_v19 = vrot.slane %v78_v1, 2  ;;  %v114_v40 = vadd.f32 %v113_v55, %v2897_v36  ;;  %v85_v42 = vrot.slane %v84_v2, 2  ;;  %v91_v44 = vrot.slane %v90_v4, 2 }
  0x25   :  { %v97_v23 = vrot.slane %v96_v11, 2  ;;  %v103_v13 = vrot.slane %v102_v15, 2  ;;  %v55_v57 = vsub.f32 %v31_v45, %v43_v60  ;;  %v56_v50 = vsub.f32 %v32_v46, %v44_v6 }
  0x26   :  { %v57_v49 = vsub.f32 %v33_v58, %v45_v9  ;;  %v58_v41 = vsub.f32 %v34_v59, %v46_v10  ;;  %v74_v28 = vadd.f32 %v73_v18, %v72_v61  ;;  %v80_v22 = vadd.f32 %v79_v19, %v78_v1 }
  0x27   :  { %v109_v20 = vrot.slane %v108_v37, 2  ;;  %v115_v47 = vrot.slane %v114_v40, 2  ;;  %v86_v14 = vadd.f32 %v85_v42, %v84_v2  ;;  %v92_v53 = vadd.f32 %v91_v44, %v90_v4 }
  0x28   :  { %v98_v5 = vadd.f32 %v97_v23, %v96_v11  ;;  %v104_v0 = vadd.f32 %v103_v13, %v102_v15  ;;  %v2941_v63 = vmul.f32 %v55_v57, %v55_v57  ;;  %v2943_v54 = vmul.f32 %v56_v50, %v56_v50 }
  0x29   :  { %v2945_v55 = vmul.f32 %v57_v49, %v57_v49  ;;  %v2947_v62 = vmul.f32 %v58_v41, %v58_v41  ;;  %v2513_v45 = vmov 1966171168   ;;  %v75_v59 = vrot.slane %v74_v28, 1 }
  0x2a   :  { %4019 = vst [vmem:[#allocation34_spill] sm:$0xff] %v2941_v63  ;;  %4020 = vst [vmem:[#allocation35_spill] sm:$0xff] %v2943_v54  ;;  %v2949_v46 = vunpack.c.l.s4 %v2513_v45  ;;  %v81_v60 = vrot.slane %v80_v22, 1  ;;  %v110_v61 = vadd.f32 %v109_v20, %v108_v37  ;;  %v116_v1 = vadd.f32 %v115_v47, %v114_v40 }
  0x2b   :  { %4021 = vst [vmem:[#allocation36_spill] sm:$0xff] %v2945_v55  ;;  %4022 = vst [vmem:[#allocation37_spill] sm:$0xff] %v2947_v62  ;;  %v87_v2 = vrot.slane %v86_v14, 1  ;;  %v93_v4 = vrot.slane %v92_v53, 1  ;;  %v99_v23 = vrot.slane %v98_v5, 1  ;;  %v105_v13 = vrot.slane %v104_v0, 1 }
  0x2c   :  { %v119_v57 = vrot.slane %v2941_v63, 4  ;;  %v125_v50 = vrot.slane %v2943_v54, 4  ;;  %v131_v49 = vrot.slane %v2945_v55, 4  ;;  %v137_v41 = vrot.slane %v2947_v62, 4 }
  0x2d   :  { %v143_v6 = vmul.f32 %v2882_v24, %v2882_v24  ;;  %v144_v9 = vmul.f32 %v2885_v27, %v2885_v27  ;;  %v145_v20 = vmul.f32 %v2887_v29, %v2887_v29  ;;  %v146_v10 = vmul.f32 %v2889_v30, %v2889_v30 }
  0x2e   :  { %v2963_v11 = vadd.f32 %v75_v59, %v74_v28  ;;  %v2965_v15 = vadd.f32 %v81_v60, %v80_v22  ;;  %v111_v18 = vrot.slane %v110_v61, 1  ;;  %v117_v19 = vrot.slane %v116_v1, 1 }
  0x2f   :  { %v2967_v37 = vadd.f32 %v87_v2, %v86_v14  ;;  %v2969_v40 = vadd.f32 %v93_v4, %v92_v53  ;;  %v2971_v42 = vadd.f32 %v99_v23, %v98_v5  ;;  %v2973_v44 = vadd.f32 %v105_v13, %v104_v0 }
  0x30   :  { %v120_v47 = vadd.f32 %v119_v57, %v2941_v63  ;;  %v126_v45 = vadd.f32 %v125_v50, %v2943_v54  ;;  %v132_v58 = vadd.f32 %v131_v49, %v2945_v55  ;;  %v138_v28 = vadd.f32 %v137_v41, %v2947_v62 }
  0x31   :  { %v155_v22 = vrot.slane %v143_v6, 4  ;;  %v161_v59 = vrot.slane %v144_v9, 4  ;;  %v167_v60 = vrot.slane %v145_v20, 4  ;;  %v173_v29 = vrot.slane %v146_v10, 4 }
  0x32   :  { %v147_v14 = vmul.f32 %v2891_v31, %v2891_v31  ;;  %v148_v5 = vmul.f32 %v2893_v32, %v2893_v32  ;;  %v149_v0 = vmul.f32 %v2895_v35, %v2895_v35  ;;  %v150_v53 = vmul.f32 %v2897_v36, %v2897_v36 }
  0x33   :  { %v156_v2 = vadd.f32 %v155_v22, %v143_v6  ;;  %v162_v4 = vadd.f32 %v161_v59, %v144_v9  ;;  %v168_v23 = vadd.f32 %v167_v60, %v145_v20  ;;  %v174_v13 = vadd.f32 %v173_v29, %v146_v10 }
  0x34   :  { %v2987_v57 = vadd.f32 %v111_v18, %v110_v61  ;;  %v2989_v50 = vadd.f32 %v117_v19, %v116_v1  ;;  %v121_v49 = vrot.slane %v120_v47, 2  ;;  %v127_v41 = vrot.slane %v126_v45, 2 }
  0x35   :  { %v133_v31 = vrot.slane %v132_v58, 2  ;;  %v139_v24 = vrot.slane %v138_v28, 2  ;;  %v151_v32 = vmul.f32 %v2941_v63, %v2941_v63  ;;  %v157_v56 = vrot.slane %v156_v2, 2 }
  0x36   :  { %v179_v35 = vrot.slane %v147_v14, 4  ;;  %v185_v52 = vrot.slane %v148_v5, 4  ;;  %v191_v51 = vrot.slane %v149_v0, 4  ;;  %v197_v36 = vrot.slane %v150_v53, 4 }
  0x37   :  { %v152_v6 = vmul.f32 %v2943_v54, %v2943_v54  ;;  %v163_v29 = vrot.slane %v162_v4, 2  ;;  %v169_v61 = vrot.slane %v168_v23, 2  ;;  %v175_v9 = vrot.slane %v174_v13, 2 }
  0x38   :  { %v180_v1 = vadd.f32 %v179_v35, %v147_v14  ;;  %v186_v20 = vadd.f32 %v185_v52, %v148_v5  ;;  %v192_v10 = vadd.f32 %v191_v51, %v149_v0  ;;  %v198_v18 = vadd.f32 %v197_v36, %v150_v53 }
  0x39   :  { %v122_v19 = vadd.f32 %v121_v49, %v120_v47  ;;  %v153_v22 = vmul.f32 %v2945_v55, %v2945_v55  ;;  %v154_v59 = vmul.f32 %v2947_v62, %v2947_v62  ;;  %v158_v60 = vadd.f32 %v157_v56, %v156_v2 }
  0x3a   :  { %v181_v63 = vrot.slane %v180_v1, 2  ;;  %v187_v48 = vrot.slane %v186_v20, 2  ;;  %v193_v43 = vrot.slane %v192_v10, 2  ;;  %v199_v39 = vrot.slane %v198_v18, 2 }
  0x3b   :  { %v2999_v54 = vadd.f32 %v127_v41, %v126_v45  ;;  %v164_v38 = vadd.f32 %v163_v29, %v162_v4  ;;  %v170_v33 = vadd.f32 %v169_v61, %v168_v23  ;;  %v176_v35 = vadd.f32 %v175_v9, %v174_v13 }
  0x3c   :  { %v182_v52 = vadd.f32 %v181_v63, %v180_v1  ;;  %v188_v51 = vadd.f32 %v187_v48, %v186_v20  ;;  %v194_v36 = vadd.f32 %v193_v43, %v192_v10  ;;  %v200_v47 = vadd.f32 %v199_v39, %v198_v18 }
  0x3d   :  { %v203_v14 = vrot.slane %v151_v32, 4  ;;  %v209_v5 = vrot.slane %v152_v6, 4  ;;  %v215_v0 = vrot.slane %v153_v22, 4  ;;  %v221_v53 = vrot.slane %v154_v59, 4 }
  0x3e   :  { %v123_v49 = vrot.slane %v122_v19, 1  ;;  %v134_v55 = vadd.f32 %v133_v31, %v132_v58  ;;  %v140_v56 = vadd.f32 %v139_v24, %v138_v28  ;;  %v159_v2 = vrot.slane %v158_v60, 1 }
  0x3f   :  { %v204_v62 = vadd.f32 %v203_v14, %v151_v32  ;;  %v210_v34 = vadd.f32 %v209_v5, %v152_v6  ;;  %v216_v26 = vadd.f32 %v215_v0, %v153_v22  ;;  %v222_v45 = vadd.f32 %v221_v53, %v154_v59 }
  0x40   :  { %v165_v41 = vrot.slane %v164_v38, 1  ;;  %v171_v4 = vrot.slane %v170_v33, 1  ;;  %v177_v23 = vrot.slane %v176_v35, 1  ;;  %v183_v13 = vrot.slane %v182_v52, 1 }
  0x41   :  { %v189_v63 = vrot.slane %v188_v51, 1  ;;  %v195_v48 = vrot.slane %v194_v36, 1  ;;  %v201_v43 = vrot.slane %v200_v47, 1  ;;  %v205_v39 = vrot.slane %v204_v62, 2 }
  0x42   :  { %v124_v29 = vadd.f32 %v123_v49, %v122_v19  ;;  %v129_v61 = vrot.slane %v2999_v54, 1  ;;  %v135_v9 = vrot.slane %v134_v55, 1  ;;  %v141_v1 = vrot.slane %v140_v56, 1 }
  0x43   :  { %v160_v31 = vadd.f32 %v159_v2, %v158_v60  ;;  %v211_v24 = vrot.slane %v210_v34, 2  ;;  %v217_v58 = vrot.slane %v216_v26, 2  ;;  %v223_v32 = vrot.slane %v222_v45, 2 }
  0x44   :  { %v166_v28 = vadd.f32 %v165_v41, %v164_v38  ;;  %v172_v6 = vadd.f32 %v171_v4, %v170_v33  ;;  %v178_v20 = vadd.f32 %v177_v23, %v176_v35  ;;  %v206_v10 = vadd.f32 %v205_v39, %v204_v62 }
  0x45   :  { %v184_v18 = vadd.f32 %v183_v13, %v182_v52  ;;  %v190_v22 = vadd.f32 %v189_v63, %v188_v51  ;;  %v196_v59 = vadd.f32 %v195_v48, %v194_v36  ;;  %v202_v14 = vadd.f32 %v201_v43, %v200_v47 }
  0x46   :  { %v3003_v5 = vmul.f32 0.125, %v2963_v11  ;;  %v3006_v19 = vmul.f32 0.125, %v2965_v15  ;;  %v3009_v0 = vmul.f32 0.125, %v2967_v37  ;;  %v3012_v60 = vmul.f32 0.125, %v2969_v40 }
  0x47   :  { %v212_v38 = vadd.f32 %v211_v24, %v210_v34  ;;  %v218_v33 = vadd.f32 %v217_v58, %v216_v26  ;;  %v224_v35 = vadd.f32 %v223_v32, %v222_v45  ;;  %v3015_v62 = vmul.f32 0.125, %v2971_v42 }
  0x48   :  { %v207_v52 = vrot.slane %v206_v10, 1  ;;  %v3018_v51 = vmul.f32 0.125, %v2973_v44  ;;  %v3021_v11 = vmul.f32 0.125, %v2987_v57  ;;  %v3024_v15 = vmul.f32 0.125, %v2989_v50 }
  0x49   :  { %v239_v37 = vmul.f32 0.125, %v160_v31  ;;  %v240_v36 = vmul.f32 0.125, %v166_v28  ;;  %v241_v40 = vmul.f32 0.125, %v172_v6  ;;  %v242_v47 = vmul.f32 0.125, %v178_v20 }
  0x4a   :  { %v243_v34 = vmul.f32 0.125, %v184_v18  ;;  %v244_v26 = vmul.f32 0.125, %v190_v22  ;;  %v245_v53 = vmul.f32 0.125, %v196_v59  ;;  %v246_v49 = vmul.f32 0.125, %v202_v14 }
  0x4b   :  { %v251_v42 = vmul.f32 %v3003_v5, %v3003_v5  ;;  %v252_v44 = vmul.f32 %v3006_v19, %v3006_v19  ;;  %v253_v57 = vmul.f32 %v3009_v0, %v3009_v0  ;;  %v254_v50 = vmul.f32 %v3012_v60, %v3012_v60 }
  0x4c   :  { %v255_v2 = vmul.f32 %v3015_v62, %v3015_v62  ;;  %v256_v45 = vmul.f32 %v3018_v51, %v3018_v51  ;;  %v257_v41 = vmul.f32 %v3021_v11, %v3021_v11  ;;  %v258_v4 = vmul.f32 %v3024_v15, %v3024_v15 }
  0x4d   :  { %v130_v23 = vadd.f32 %v129_v61, %v2999_v54  ;;  %v136_v13 = vadd.f32 %v135_v9, %v134_v55  ;;  %v142_v63 = vadd.f32 %v141_v1, %v140_v56  ;;  %v213_v48 = vrot.slane %v212_v38, 1  ;;  %v647_v55 = vld [vmem:[%s3911_s4 + $0x280] sm:$0xff]  ;;  %v648_v56 = vld [vmem:[%s3911_s4 + $0x288] sm:$0xff] }
  0x4e   :  { %v263_v43 = vsub.f32 %v239_v37, %v251_v42  ;;  %v264_v39 = vsub.f32 %v240_v36, %v252_v44  ;;  %v265_v31 = vsub.f32 %v241_v40, %v253_v57  ;;  %v266_v24 = vsub.f32 %v242_v47, %v254_v50 }
  0x4f   :  { %v219_v58 = vrot.slane %v218_v33, 1  ;;  %v267_v32 = vsub.f32 %v243_v34, %v255_v2  ;;  %v268_v28 = vsub.f32 %v244_v26, %v256_v45  ;;  %v269_v6 = vsub.f32 %v245_v53, %v257_v41 }
  0x50   :  { %v208_v20 = vadd.f32 %v207_v52, %v206_v10  ;;  %v225_v18 = vrot.slane %v224_v35, 1  ;;  %v3043_v22 = vmul.f32 0.125, %v124_v29  ;;  %v270_v59 = vsub.f32 %v246_v49, %v258_v4 }
  0x51   :  { %v275_v14 = vmax.f32 %v263_v43, 0.0  ;;  %v276_v25 = vmax.f32 %v264_v39, 0.0  ;;  %v277_v17 = vmax.f32 %v265_v31, 0.0  ;;  %v278_v54 = vmax.f32 %v266_v24, 0.0 }
  0x52   :  { %v214_v61 = vadd.f32 %v213_v48, %v212_v38  ;;  %v3051_v9 = vmul.f32 0.125, %v130_v23  ;;  %v3053_v1 = vmul.f32 0.125, %v136_v13  ;;  %v279_v29 = vmax.f32 %v267_v32, 0.0  ;;  %v679_v38 = vld [vmem:[%s3911_s4 + $0x380] sm:$0xff] }
  0x53   :  { %v220_v10 = vadd.f32 %v219_v58, %v218_v33  ;;  %v3055_v52 = vmul.f32 0.125, %v142_v63  ;;  %v280_v37 = vmax.f32 %v268_v28, 0.0  ;;  %v281_v36 = vmax.f32 %v269_v6, 0.0  ;;  %v680_v33 = vld [vmem:[%s3911_s4 + $0x388] sm:$0xff] }
  0x54   :  { %v289_v40 = vadd.f32 1e-05, %v275_v14  ;;  %v290_v47 = vadd.f32 1e-05, %v276_v25  ;;  %v291_v34 = vadd.f32 1e-05, %v277_v17  ;;  %v3057_v26 = vpack.c.bf16 %v648_v56, %v647_v55 }
  0x55   :  { %v226_v53 = vadd.f32 %v225_v18, %v224_v35  ;;  %v247_v49 = vmul.f32 0.125, %v208_v20  ;;  %v282_v42 = vmax.f32 %v270_v59, 0.0  ;;  %v292_v44 = vadd.f32 1e-05, %v278_v54 }
  0x56   :  { %v248_v57 = vmul.f32 0.125, %v214_v61  ;;  %v259_v50 = vmul.f32 %v3043_v22, %v3043_v22  ;;  %v293_v25 = vadd.f32 1e-05, %v279_v29  ;;  %2489 = vrsqrt.f32 %v289_v40  ;;  %2169 = vmatprep.subr.bf16.mxu0 %v3057_v26 }
  0x57   :  { %v249_v17 = vmul.f32 0.125, %v220_v10  ;;  %v260_v35 = vmul.f32 %v3051_v9, %v3051_v9  ;;  %v294_v2 = vadd.f32 1e-05, %v280_v37  ;;  %2491 = vrsqrt.f32 %v290_v47 }
  0x58   :  { %v261_v45 = vmul.f32 %v3053_v1, %v3053_v1  ;;  %v295_v41 = vadd.f32 1e-05, %v281_v36  ;;  %2493 = vrsqrt.f32 %v291_v34  ;;  %v3072_v4 = vpack.c.bf16 %v680_v33, %v679_v38 }
  0x59   :  { %v250_v23 = vmul.f32 0.125, %v226_v53  ;;  %v262_v13 = vmul.f32 %v3055_v52, %v3055_v52  ;;  %v296_v63 = vadd.f32 1e-05, %v282_v42  ;;  %2495 = vrsqrt.f32 %v292_v44 }
  0x5a   :  { %v271_v48 = vsub.f32 %v247_v49, %v259_v50  ;;  %2497 = vrsqrt.f32 %v293_v25  ;;  %2201 = vmatprep.subr.bf16.mxu1 %v3072_v4  ;;  %v272_v43 = vsub.f32 %v248_v57, %v260_v35  ;;  %v273_v39 = vsub.f32 %v249_v17, %v261_v45 }
  0x5b   :  { %2499 = vrsqrt.f32 %v294_v2  ;;  %v331_v31 = vunpack.c.0.s8 %v2949_v46  ;;  %v4023_v24 = vlaneseq  ;;  %v274_v32 = vsub.f32 %v250_v23, %v262_v13  ;;  %v287_v2 = vld [vmem:[%s3914_s2] sm:$0xff] }
  0x5c   :  { %2501 = vrsqrt.f32 %v295_v41  ;;  %v283_v28 = vmax.f32 %v271_v48, 0.0  ;;  %v284_v6 = vmax.f32 %v272_v43, 0.0  ;;  %v285_v18 = vmax.f32 %v273_v39, 0.0 }
  0x5d   :  { %v3079_v58 = vshrl.u32 %v4023_v24, 7  ;;  %2503 = vrsqrt.f32 %v296_v63  ;;  %v286_v54 = vmax.f32 %v274_v32, 0.0 }
  0x5e   :  { %v297_v56 = vadd.f32 1e-05, %v283_v28  ;;  %v298_v10 = vadd.f32 1e-05, %v284_v6  ;;  %v299_v37 = vadd.f32 1e-05, %v285_v18 }
  0x5f   :  { %v3082_v59 = vsub.s32 %v331_v31, %v3079_v58  ;;  %v300_v34 = vadd.f32 1e-05, %v286_v54  ;;  %v3094_v23 = vsub.s32 0, %v3079_v58  ;;  %v3097_v13 = vsub.s32 1, %v3079_v58 }
  0x60   :  { %v2490_v20 = vpop.eup %2489  ;;  %2505 = vrsqrt.f32 %v297_v56  ;;  %v3100_v63 = vsub.s32 2, %v3079_v58  ;;  %v3103_v43 = vsub.s32 3, %v3079_v58  ;;  %v3955_v39 = vsub.s32 4, %v3079_v58 }
  0x61   :  { %v2492_v14 = vpop.eup %2491  ;;  %2507 = vrsqrt.f32 %v298_v10  ;;  %v428_v31 = vsub.s32 5, %v3079_v58  ;;  %v3954_v24 = vsub.s32 6, %v3079_v58  ;;  %v436_v6 = vsub.s32 7, %v3079_v58 }
  0x62   :  { %v2494_v55 = vpop.eup %2493  ;;  %v325_v61 = vcombine.low %v2490_v20, %v2492_v14  ;;  %2509 = vrsqrt.f32 %v299_v37 }
  0x63   :  { %v2496_v29 = vpop.eup %2495  ;;  %2511 = vrsqrt.f32 %v300_v34 }
  0x64   :  { %v2498_v46 = vpop.eup %2497  ;;  %v326_v36 = vcombine.low %v2494_v55, %v2496_v29  ;;  %v335_v40 = vrot.slane %v325_v61, %v3082_v59 }
  0x65   :  { %v2500_v47 = vpop.eup %2499 }
  0x66   :  { %v2502_v53 = vpop.eup %2501  ;;  %v327_v49 = vcombine.low %v2498_v46, %v2500_v47  ;;  %v342_v42 = vrot.slane %v326_v36, %v3082_v59 }
  0x67   :  { %v2504_v44 = vpop.eup %2503 }
  0x68   :  { %v328_v38 = vcombine.low %v2502_v53, %v2504_v44  ;;  %v349_v33 = vrot.slane %v327_v49, %v3082_v59  ;;  %v357_v57 = vcombine.low %v335_v40, %v342_v42 }
  0x6a   :  { %v356_v50 = vrot.slane %v328_v38, %v3082_v59  ;;  %v365_v17 = vrot.slane %v357_v57, %v3082_v59  ;;  %v2506_v45 = vpop.eup %2505 }
  0x6b   :  { %v2508_v48 = vpop.eup %2507 }
  0x6c   :  { %v358_v25 = vcombine.low %v349_v33, %v356_v50  ;;  %v2510_v32 = vpop.eup %2509  ;;  %v374_v18 = vcombine.low %v2506_v45, %v2508_v48  ;;  %v631_v45 = vld [vmem:[%s3911_s4 + $0x200] sm:$0xff]  ;;  %v632_v48 = vld [vmem:[%s3911_s4 + $0x208] sm:$0xff] }
  0x6d   :  { %v2512_v20 = vpop.eup %2511 }
  0x6e   :  { %v372_v35 = vrot.slane %v358_v25, %v3082_v59  ;;  %v375_v46 = vcombine.low %v2510_v32, %v2512_v20  ;;  %v663_v32 = vld [vmem:[%s3911_s4 + $0x300] sm:$0xff]  ;;  %v288_v20 = vld [vmem:[%s3914_s2 + $0x8] sm:$0xf] }
  0x70   :  { %v373_v41 = vcombine.low %v365_v17, %v372_v35  ;;  %v389_v57 = vrot.slane %v375_v46, %v3082_v59  ;;  %v649_v46 = vld [vmem:[%s3911_s4 + $0x290] sm:$0xff] }
  0x72   :  { %v400_v28 = vmul.f32 %v373_v41, %v287_v2  ;;  %v402_v2 = vld [vmem:[%s3915_s3] sm:$0xff] }
  0x74   :  { %v3110_v14 = vrot.slane %v400_v28, %v3094_v23  ;;  %v3113_v54 = vrot.slane %v400_v28, %v3097_v13  ;;  %v3116_v55 = vrot.slane %v400_v28, %v3100_v63  ;;  %v3119_v56 = vrot.slane %v400_v28, %v3103_v43 }
  0x75   :  { %v3123_v61 = vrot.slane %v400_v28, %v3955_v39  ;;  %v3127_v29 = vrot.slane %v400_v28, %v428_v31  ;;  %v3131_v10 = vrot.slane %v400_v28, %v3954_v24  ;;  %v3135_v37 = vrot.slane %v400_v28, %v436_v6  ;;  %v664_v28 = vld [vmem:[%s3911_s4 + $0x308] sm:$0xff]  ;;  %v642_v24 = vld [vmem:[%s3911_s4 + $0x258] sm:$0xff]  ;;  %v643_v39 = vld [vmem:[%s3911_s4 + $0x260] sm:$0xff] }
  0x76   :  { %v466_v36 = vmul.f32 %v3110_v14, %v3003_v5  ;;  %v467_v40 = vmul.f32 %v3113_v54, %v3006_v19  ;;  %v468_v47 = vmul.f32 %v3116_v55, %v3009_v0  ;;  %v469_v34 = vmul.f32 %v3119_v56, %v3012_v60 }
  0x77   :  { %4024 = vst [vmem:[#allocation38_spill] sm:$0xff] %v3123_v61  ;;  %4025 = vst [vmem:[#allocation39_spill] sm:$0xff] %v3131_v10  ;;  %v470_v53 = vmul.f32 %v3123_v61, %v3015_v62  ;;  %v471_v49 = vmul.f32 %v3127_v29, %v3018_v51  ;;  %v472_v42 = vmul.f32 %v3131_v10, %v3021_v11 }
  0x78   :  { %v473_v5 = vmul.f32 %v3135_v37, %v3024_v15  ;;  %v490_v44 = vcombine.low %v466_v36, %v467_v40  ;;  %v491_v19 = vcombine.low %v468_v47, %v469_v34  ;;  %v382_v60 = vrot.slane %v374_v18, %v3082_v59  ;;  %v650_v40 = vld [vmem:[%s3911_s4 + $0x298] sm:$0xff]  ;;  %v681_v47 = vld [vmem:[%s3911_s4 + $0x390] sm:$0xff] }
  0x79   :  { %v492_v38 = vcombine.low %v470_v53, %v471_v49  ;;  %v682_v34 = vld [vmem:[%s3911_s4 + $0x398] sm:$0xff]  ;;  %v3194_v53 = vpack.c.bf16 %v632_v48, %v631_v45  ;;  %v3196_v49 = vpack.c.bf16 %v664_v28, %v663_v32  ;;  %v667_v28 = vld [vmem:[%s3911_s4 + $0x320] sm:$0xff] }
  0x7a   :  { %v493_v33 = vcombine.low %v472_v42, %v473_v5  ;;  %v500_v0 = vrot.slane %v490_v44, %v3082_v59  ;;  %v507_v62 = vrot.slane %v491_v19, %v3082_v59  ;;  %v390_v17 = vcombine.low %v382_v60, %v389_v57 }
  0x7b   :  { %v514_v51 = vrot.slane %v492_v38, %v3082_v59  ;;  %v633_v38 = vld [vmem:[%s3911_s4 + $0x210] sm:$0xff]  ;;  %v3212_v60 = vpack.c.bf16 %v650_v40, %v649_v46  ;;  %v3214_v57 = vpack.c.bf16 %v682_v34, %v681_v47  ;;  %v654_v46 = vld [vmem:[%s3911_s4 + $0x2b8] sm:$0xff] }
  0x7c   :  { %v521_v50 = vrot.slane %v493_v33, %v3082_v59  ;;  %v522_v11 = vcombine.low %v500_v0, %v507_v62  ;;  %v397_v18 = vrot.slane %v390_v17, %v3082_v59  ;;  %v634_v33 = vld [vmem:[%s3911_s4 + $0x218] sm:$0xff]  ;;  %v665_v62 = vld [vmem:[%s3911_s4 + $0x310] sm:$0xff]  ;;  %v684_v17 = vld [vmem:[%s3911_s4 + $0x3a8] sm:$0xff] }
  0x7d   :  { %v685_v40 = vld [vmem:[%s3911_s4 + $0x3b0] sm:$0xff]  ;;  %v686_v47 = vld [vmem:[%s3911_s4 + $0x3b8] sm:$0xff] }
  0x7e   :  { %v523_v25 = vcombine.low %v514_v51, %v521_v50  ;;  %v530_v15 = vrot.slane %v522_v11, %v3082_v59  ;;  %v401_v0 = vmul.f32 %v397_v18, %v288_v20  ;;  %v666_v51 = vld [vmem:[%s3911_s4 + $0x318] sm:$0xff]  ;;  %v651_v50 = vld [vmem:[%s3911_s4 + $0x2a0] sm:$0xff]  ;;  %v652_v11 = vld [vmem:[%s3911_s4 + $0x2a8] sm:$0xff] }
  0x7f   :  { %v3244_v45 = vpack.c.bf16 %v666_v51, %v665_v62  ;;  %v3257_v48 = vpack.c.bf16 %v652_v11, %v651_v50  ;;  %v668_v20 = vld [vmem:[%s3911_s4 + $0x328] sm:$0xff]  ;;  %v653_v18 = vld [vmem:[%s3911_s4 + $0x2b0] sm:$0xff]  ;;  %v3304_v62 = vpack.c.bf16 %v686_v47, %v685_v40  ;;  %v670_v50 = vld [vmem:[%s3911_s4 + $0x338] sm:$0xff] }
  0x80   :  { %v537_v35 = vrot.slane %v523_v25, %v3082_v59  ;;  %v683_v25 = vld [vmem:[%s3911_s4 + $0x3a0] sm:$0xff]  ;;  %v3280_v34 = vrot.slane %v401_v0, %v3094_v23  ;;  %v669_v51 = vld [vmem:[%s3911_s4 + $0x330] sm:$0xff]  ;;  %v672_v40 = vld [vmem:[%s3911_s4 + $0x348] sm:$0xff] }
  0x81   :  { %v3259_v32 = vpack.c.bf16 %v684_v17, %v683_v25  ;;  %v655_v11 = vld [vmem:[%s3911_s4 + $0x2c0] sm:$0xff]  ;;  %v656_v17 = vld [vmem:[%s3911_s4 + $0x2c8] sm:$0xff]  ;;  %v657_v47 = vld [vmem:[%s3911_s4 + $0x2d0] sm:$0xff] }
  0x82   :  { %v538_v41 = vcombine.low %v530_v15, %v537_v35  ;;  %4027 = vst [vmem:[#allocation41_spill] sm:$0xff] %v3280_v34 }
  0x84   :  { %v3183_v36 = vsub.f32 %v402_v2, %v538_v41  ;;  %v3242_v2 = vpack.c.bf16 %v634_v33, %v633_v38  ;;  %v635_v41 = vld [vmem:[%s3911_s4 + $0x220] sm:$0xff]  ;;  %v637_v38 = vld [vmem:[%s3911_s4 + $0x230] sm:$0xff]  ;;  %v638_v33 = vld [vmem:[%s3911_s4 + $0x238] sm:$0xff] }
  0x86   :  { %v781_v42 = vrot.slane %v3183_v36, %v3097_v13  ;;  %v777_v5 = vrot.slane %v3183_v36, %v3094_v23  ;;  %v789_v44 = vrot.slane %v3183_v36, %v3103_v43  ;;  %v785_v19 = vrot.slane %v3183_v36, %v3100_v63 }
  0x87   :  { %v797_v15 = vrot.slane %v3183_v36, %v428_v31  ;;  %v805_v35 = vrot.slane %v3183_v36, %v436_v6  ;;  %v636_v31 = vld [vmem:[%s3911_s4 + $0x228] sm:$0xff]  ;;  %v3253_v6 = vrot.slane %v401_v0, %v3097_v13 }
  0x88   :  { %898 = vmatprep.mubr.f32.mxu0 %v781_v42  ;;  %968 = vmatprep.mubr.f32.mxu1 %v789_v44  ;;  %v3283_v42 = vrot.slane %v401_v0, %v3100_v63  ;;  %v3290_v44 = vpack.c.bf16 %v636_v31, %v635_v41  ;;  %v474_v41 = vmul.f32 %v3280_v34, %v3043_v22  ;;  %v640_v22 = vld [vmem:[%s3911_s4 + $0x248] sm:$0xff] }
  0x89   :  { %899 = vmatmul.mubr.f32.vlgmr.msra.gmra.mrb[0].mxu0 %v777_v5  ;;  %969 = vmatmul.mubr.f32.vlgmr.msra.gmra.mrb[0].mxu1 %v785_v19  ;;  %4026 = vst [vmem:[#allocation40_spill] sm:$0xff] %v3253_v6  ;;  %v3286_v5 = vrot.slane %v401_v0, %v3103_v43  ;;  %v3292_v19 = vpack.c.bf16 %v668_v20, %v667_v28 }
  0x8a   :  { %2171 = vmatpush3.bf16.msra.mxu0 %v3194_v53  ;;  %2203 = vmatpush3.bf16.msra.mxu1 %v3196_v49  ;;  %4028 = vst [vmem:[#allocation42_spill] sm:$0xff] %v3283_v42  ;;  %v3302_v0 = vpack.c.bf16 %v654_v46, %v653_v18  ;;  %v475_v25 = vmul.f32 %v3253_v6, %v3051_v9  ;;  %v639_v18 = vld [vmem:[%s3911_s4 + $0x240] sm:$0xff]  ;;  %v646_v6 = vld [vmem:[%s3911_s4 + $0x278] sm:$0xff] }
  0x8b   :  { %2173 = vmatprep.subr.bf16.mxu0 %v3212_v60  ;;  %2205 = vmatprep.subr.bf16.mxu1 %v3214_v57  ;;  %4029 = vst [vmem:[#allocation43_spill] sm:$0xff] %v3286_v5  ;;  %v476_v31 = vmul.f32 %v3283_v42, %v3053_v1  ;;  %v477_v9 = vmul.f32 %v3286_v5, %v3055_v52  ;;  %v671_v46 = vld [vmem:[%s3911_s4 + $0x340] sm:$0xff]  ;;  %v644_v42 = vld [vmem:[%s3911_s4 + $0x268] sm:$0xff]  ;;  %v645_v5 = vld [vmem:[%s3911_s4 + $0x270] sm:$0xff] }
  0x8c   :  { %1038 = vmatprep.mubr.f32.mxu0 %v797_v15  ;;  %1108 = vmatprep.mubr.f32.mxu1 %v805_v35  ;;  %v687_v15 = vld [vmem:[%s3911_s4 + $0x3c0] sm:$0xff]  ;;  %v688_v35 = vld [vmem:[%s3911_s4 + $0x3c8] sm:$0xff]  ;;  %v3334_v28 = vpack.c.bf16 %v638_v33, %v637_v38  ;;  %v3336_v20 = vpack.c.bf16 %v670_v50, %v669_v51  ;;  %v3346_v1 = vpack.c.bf16 %v656_v17, %v655_v11  ;;  %v658_v38 = vld [vmem:[%s3911_s4 + $0x2d8] sm:$0xff] }
  0x8d   :  { %v3348_v52 = vpack.c.bf16 %v688_v35, %v687_v15  ;;  %v689_v33 = vld [vmem:[%s3911_s4 + $0x3d0] sm:$0xff]  ;;  %v690_v51 = vld [vmem:[%s3911_s4 + $0x3d8] sm:$0xff]  ;;  %v539_v50 = vcombine.low %v474_v41, %v475_v25  ;;  %v540_v11 = vcombine.low %v476_v31, %v477_v9  ;;  %v3370_v17 = vpack.c.bf16 %v640_v22, %v639_v18  ;;  %v659_v18 = vld [vmem:[%s3911_s4 + $0x2e0] sm:$0xff] }
  0x8e   :  { %2175 = vmatpush3.bf16.msra.mxu0 %v3242_v2  ;;  %2207 = vmatpush3.bf16.msra.mxu1 %v3244_v45  ;;  %v3372_v15 = vpack.c.bf16 %v672_v40, %v671_v46  ;;  %v641_v35 = vld [vmem:[%s3911_s4 + $0x250] sm:$0xff]  ;;  %v3382_v25 = vpack.c.bf16 %v658_v38, %v657_v47  ;;  %v3384_v41 = vpack.c.bf16 %v690_v51, %v689_v33  ;;  %v674_v9 = vld [vmem:[%s3911_s4 + $0x358] sm:$0xff]  ;;  %v660_v22 = vld [vmem:[%s3911_s4 + $0x2e8] sm:$0xff] }
  0x8f   :  { %2177 = vmatprep.subr.bf16.mxu0 %v3257_v48  ;;  %2209 = vmatprep.subr.bf16.mxu1 %v3259_v32  ;;  %v673_v31 = vld [vmem:[%s3911_s4 + $0x350] sm:$0xff]  ;;  %v691_v46 = vld [vmem:[%s3911_s4 + $0x3e0] sm:$0xff]  ;;  %v692_v40 = vld [vmem:[%s3911_s4 + $0x3e8] sm:$0xff]  ;;  %v547_v47 = vrot.slane %v539_v50, %v3082_v59  ;;  %v554_v38 = vrot.slane %v540_v11, %v3082_v59  ;;  %v3408_v33 = vpack.c.bf16 %v642_v24, %v641_v35 }
  0x90   :  { %v3410_v51 = vpack.c.bf16 %v674_v9, %v673_v31  ;;  %v3420_v50 = vpack.c.bf16 %v660_v22, %v659_v18  ;;  %v3422_v11 = vpack.c.bf16 %v692_v40, %v691_v46  ;;  %v675_v24 = vld [vmem:[%s3911_s4 + $0x360] sm:$0xff]  ;;  %v676_v35 = vld [vmem:[%s3911_s4 + $0x368] sm:$0xff]  ;;  %v661_v31 = vld [vmem:[%s3911_s4 + $0x2f0] sm:$0xff]  ;;  %v3444_v40 = vpack.c.bf16 %v644_v42, %v643_v39 }
  0x91   :  { %v662_v9 = vld [vmem:[%s3911_s4 + $0x2f8] sm:$0xff]  ;;  %v693_v18 = vld [vmem:[%s3911_s4 + $0x3f0] sm:$0xff]  ;;  %v555_v46 = vcombine.low %v547_v47, %v554_v38  ;;  %v3446_v34 = vpack.c.bf16 %v676_v35, %v675_v24  ;;  %v711_v24 = vld [vmem:[%s3911_s4 + $0x480] sm:$0xff]  ;;  %v3484_v10 = vpack.c.bf16 %v646_v6, %v645_v5 }
  0x92   :  { %2179 = vmatpush3.bf16.msra.mxu0 %v3290_v44  ;;  %2211 = vmatpush3.bf16.msra.mxu1 %v3292_v19  ;;  %4030 = vst [vmem:[#allocation44_spill] sm:$0xff] %v3410_v51  ;;  %4031 = vst [vmem:[#allocation45_spill] sm:$0xff] %v3420_v50  ;;  %v694_v22 = vld [vmem:[%s3911_s4 + $0x3f8] sm:$0xff]  ;;  %v3456_v47 = vpack.c.bf16 %v662_v9, %v661_v31  ;;  %v677_v39 = vld [vmem:[%s3911_s4 + $0x370] sm:$0xff] }
  0x93   :  { %2181 = vmatprep.subr.bf16.mxu0 %v3302_v0  ;;  %2213 = vmatprep.subr.bf16.mxu1 %v3304_v62  ;;  %4032 = vst [vmem:[#allocation46_spill] sm:$0xff] %v3422_v11  ;;  %4033 = vst [vmem:[#allocation47_spill] sm:$0xff] %v3444_v40  ;;  %v3458_v38 = vpack.c.bf16 %v694_v22, %v693_v18  ;;  %v678_v42 = vld [vmem:[%s3911_s4 + $0x378] sm:$0xff]  ;;  %v712_v35 = vld [vmem:[%s3911_s4 + $0x488] sm:$0xff]  ;;  %v562_v18 = vrot.slane %v555_v46, %v3082_v59 }
  0x94   :  { %4034 = vst [vmem:[#allocation48_spill] sm:$0xff] %v3446_v34  ;;  %4035 = vst [vmem:[#allocation49_spill] sm:$0xff] %v3456_v47  ;;  %v743_v31 = vld [vmem:[%s3911_s4 + $0x580] sm:$0xff]  ;;  %v744_v9 = vld [vmem:[%s3911_s4 + $0x588] sm:$0xff]  ;;  %v3486_v61 = vpack.c.bf16 %v678_v42, %v677_v39  ;;  %v3496_v46 = vpack.c.bf16 %v712_v35, %v711_v24 }
  0x95   :  { %4036 = vst [vmem:[#allocation50_spill] sm:$0xff] %v3458_v38  ;;  %v403_v22 = vld [vmem:[%s3915_s3 + $0x8] sm:$0xf]  ;;  %v727_v6 = vld [vmem:[%s3911_s4 + $0x500] sm:$0xff]  ;;  %v713_v39 = vld [vmem:[%s3911_s4 + $0x490] sm:$0xff] }
  0x96   :  { %2183 = vmatpush3.bf16.msra.mxu0 %v3334_v28  ;;  %2215 = vmatpush3.bf16.msra.mxu1 %v3336_v20  ;;  %v696_v59 = vld [vmem:[%s3911_s4 + $0x408] sm:$0xff]  ;;  %v714_v42 = vld [vmem:[%s3911_s4 + $0x498] sm:$0xff]  ;;  %v745_v24 = vld [vmem:[%s3911_s4 + $0x590] sm:$0xff] }
  0x97   :  { %2185 = vmatprep.subr.bf16.mxu0 %v3346_v1  ;;  %2217 = vmatprep.subr.bf16.mxu1 %v3348_v52  ;;  %v728_v5 = vld [vmem:[%s3911_s4 + $0x508] sm:$0xff]  ;;  %v746_v35 = vld [vmem:[%s3911_s4 + $0x598] sm:$0xff] }
  0x9a   :  { %2187 = vmatpush3.bf16.msra.mxu0 %v3370_v17  ;;  %2219 = vmatpush3.bf16.msra.mxu1 %v3372_v15 }
  0x9b   :  { %2189 = vmatprep.subr.bf16.mxu0 %v3382_v25  ;;  %2221 = vmatprep.subr.bf16.mxu1 %v3384_v41 }
  0x9e   :  { %2191 = vmatpush3.bf16.msra.mxu0 %v3408_v33  ;;  %2223 = vmatpush3.bf16.msra.mxu1 %v3410_v51  ;;  %v3530_v51 = vpack.c.bf16 %v728_v5, %v727_v6  ;;  %v716_v6 = vld [vmem:[%s3911_s4 + $0x4a8] sm:$0xff]  ;;  %v747_v5 = vld [vmem:[%s3911_s4 + $0x5a0] sm:$0xff] }
  0x9f   :  { %2193 = vmatprep.subr.bf16.mxu0 %v3420_v50  ;;  %2225 = vmatprep.subr.bf16.mxu1 %v3422_v11  ;;  %v695_v11 = vld [vmem:[%s3911_s4 + $0x400] sm:$0xff] }
  0xa0   :  { %v3528_v50 = vpack.c.bf16 %v696_v59, %v695_v11  ;;  %v729_v11 = vld [vmem:[%s3911_s4 + $0x510] sm:$0xff]  ;;  %v715_v59 = vld [vmem:[%s3911_s4 + $0x4a0] sm:$0xff] }
  0xa2   :  { %2195 = vmatpush3.bf16.msra.mxu0 %v3444_v40  ;;  %2227 = vmatpush3.bf16.msra.mxu1 %v3446_v34  ;;  %v3498_v40 = vpack.c.bf16 %v744_v9, %v743_v31  ;;  %v3518_v31 = vsub.f32 %v403_v22, %v562_v18  ;;  %v4038_v9 = vsub.s32 4, %v3079_v58  ;;  %v697_v18 = vld [vmem:[%s3911_s4 + $0x410] sm:$0xff]  ;;  %v698_v22 = vld [vmem:[%s3911_s4 + $0x418] sm:$0xff] }
  0xa3   :  { %2197 = vmatprep.subr.bf16.mxu0 %v3456_v47  ;;  %2229 = vmatprep.subr.bf16.mxu1 %v3458_v38  ;;  %v4039_v47 = vsub.s32 6, %v3079_v58  ;;  %v3540_v58 = vpack.c.bf16 %v714_v42, %v713_v39  ;;  %v748_v39 = vld [vmem:[%s3911_s4 + $0x5a8] sm:$0xff] }
  0xa4   :  { %4037 = vst [vmem:[#allocation51_spill] sm:$0xff] %v3498_v40  ;;  %v793_v38 = vrot.slane %v3183_v36, %v4038_v9  ;;  %v813_v42 = vrot.slane %v3518_v31, %v3097_v13  ;;  %v700_v13 = vld [vmem:[%s3911_s4 + $0x428] sm:$0xff] }
  0xa5   :  { %v801_v34 = vrot.slane %v3183_v36, %v4039_v47  ;;  %v3542_v36 = vpack.c.bf16 %v746_v35, %v745_v24  ;;  %v730_v47 = vld [vmem:[%s3911_s4 + $0x518] sm:$0xff]  ;;  %v821_v24 = vrot.slane %v3518_v31, %v3103_v43  ;;  %v3568_v35 = vpack.c.bf16 %v698_v22, %v697_v18  ;;  %v732_v18 = vld [vmem:[%s3911_s4 + $0x528] sm:$0xff]  ;;  %v717_v22 = vld [vmem:[%s3911_s4 + $0x4b0] sm:$0xff] }
  0xa6   :  { %2199 = vmatpush3.bf16.msra.mxu0 %v3484_v10  ;;  %2231 = vmatpush3.bf16.msra.mxu1 %v3486_v61  ;;  %v3570_v9 = vpack.c.bf16 %v730_v47, %v729_v11  ;;  %v3580_v43 = vpack.c.bf16 %v716_v6, %v715_v59  ;;  %v718_v11 = vld [vmem:[%s3911_s4 + $0x4b8] sm:$0xff]  ;;  %v749_v47 = vld [vmem:[%s3911_s4 + $0x5b0] sm:$0xff] }
  0xa7   :  { %2233 = vmatprep.subr.bf16.mxu0 %v3496_v46  ;;  %2265 = vmatprep.subr.bf16.mxu1 %v3498_v40  ;;  %4040 = vst [vmem:[#allocation52_spill] sm:$0xff] %v3542_v36  ;;  %v699_v40 = vld [vmem:[%s3911_s4 + $0x420] sm:$0xff]  ;;  %v750_v59 = vld [vmem:[%s3911_s4 + $0x5b8] sm:$0xff] }
  0xa8   :  { %4041 = vst [vmem:[#allocation53_spill] sm:$0xff] %v3570_v9  ;;  %4042 = vst [vmem:[#allocation54_spill] sm:$0xff] %v3580_v43  ;;  %v3604_v6 = vpack.c.bf16 %v700_v13, %v699_v40  ;;  %v733_v40 = vld [vmem:[%s3911_s4 + $0x530] sm:$0xff]  ;;  %v734_v13 = vld [vmem:[%s3911_s4 + $0x538] sm:$0xff] }
  0xa9   :  { %1039 = vmatmul.mubr.f32.vlgmr.msra.gmra.mrb[2].mxu0 %v793_v38  ;;  %1109 = vmatmul.mubr.f32.vlgmr.msra.gmra.mrb[2].mxu1 %v801_v34  ;;  %v3582_v34 = vpack.c.bf16 %v748_v39, %v747_v5  ;;  %v731_v38 = vld [vmem:[%s3911_s4 + $0x520] sm:$0xff]  ;;  %v701_v39 = vld [vmem:[%s3911_s4 + $0x430] sm:$0xff] }
  0xaa   :  { %2235 = vmatpush3.bf16.msra.mxu0 %v3528_v50  ;;  %2267 = vmatpush3.bf16.msra.mxu1 %v3530_v51  ;;  %4044 = vst [vmem:[#allocation56_spill] sm:$0xff] %v3604_v6  ;;  %v3606_v5 = vpack.c.bf16 %v732_v18, %v731_v38  ;;  %v719_v38 = vld [vmem:[%s3911_s4 + $0x4c0] sm:$0xff]  ;;  %v720_v18 = vld [vmem:[%s3911_s4 + $0x4c8] sm:$0xff] }
  0xab   :  { %2237 = vmatprep.subr.bf16.mxu0 %v3540_v58  ;;  %2269 = vmatprep.subr.bf16.mxu1 %v3542_v36  ;;  %4043 = vst [vmem:[#allocation55_spill] sm:$0xff] %v3582_v34  ;;  %v702_v36 = vld [vmem:[%s3911_s4 + $0x438] sm:$0xff] }
  0xac   :  { %1178 = vmatprep.mubr.f32.mxu0 %v813_v42  ;;  %1248 = vmatprep.mubr.f32.mxu1 %v821_v24  ;;  %4045 = vst [vmem:[#allocation57_spill] sm:$0xff] %v3606_v5  ;;  %v3616_v42 = vpack.c.bf16 %v718_v11, %v717_v22  ;;  %v3618_v24 = vpack.c.bf16 %v750_v59, %v749_v47  ;;  %v751_v22 = vld [vmem:[%s3911_s4 + $0x5c0] sm:$0xff]  ;;  %v752_v11 = vld [vmem:[%s3911_s4 + $0x5c8] sm:$0xff] }
  0xad   :  { %v3640_v47 = vpack.c.bf16 %v702_v36, %v701_v39  ;;  %v3642_v59 = vpack.c.bf16 %v734_v13, %v733_v40  ;;  %v735_v36 = vld [vmem:[%s3911_s4 + $0x540] sm:$0xff]  ;;  %v736_v39 = vld [vmem:[%s3911_s4 + $0x548] sm:$0xff]  ;;  %v721_v40 = vld [vmem:[%s3911_s4 + $0x4d0] sm:$0xff] }
  0xae   :  { %2239 = vmatpush3.bf16.msra.mxu0 %v3568_v35  ;;  %2271 = vmatpush3.bf16.msra.mxu1 %v3570_v9  ;;  %4046 = vst [vmem:[#allocation58_spill] sm:$0xff] %v3616_v42  ;;  %4047 = vst [vmem:[#allocation59_spill] sm:$0xff] %v3618_v24  ;;  %v3652_v9 = vpack.c.bf16 %v720_v18, %v719_v38  ;;  %v722_v13 = vld [vmem:[%s3911_s4 + $0x4d8] sm:$0xff]  ;;  %v753_v38 = vld [vmem:[%s3911_s4 + $0x5d0] sm:$0xff] }
  0xaf   :  { %2241 = vmatprep.subr.bf16.mxu0 %v3580_v43  ;;  %2273 = vmatprep.subr.bf16.mxu1 %v3582_v34  ;;  %4048 = vst [vmem:[#allocation60_spill] sm:$0xff] %v3640_v47  ;;  %4049 = vst [vmem:[#allocation61_spill] sm:$0xff] %v3642_v59  ;;  %v703_v34 = vld [vmem:[%s3911_s4 + $0x440] sm:$0xff]  ;;  %v704_v43 = vld [vmem:[%s3911_s4 + $0x448] sm:$0xff] }
  0xb0   :  { %4050 = vst [vmem:[#allocation62_spill] sm:$0xff] %v3652_v9  ;;  %v754_v18 = vld [vmem:[%s3911_s4 + $0x5d8] sm:$0xff] }
  0xb2   :  { %2243 = vmatpush3.bf16.msra.mxu0 %v3604_v6  ;;  %2275 = vmatpush3.bf16.msra.mxu1 %v3606_v5  ;;  %v3654_v6 = vpack.c.bf16 %v752_v11, %v751_v22  ;;  %v3676_v22 = vpack.c.bf16 %v704_v43, %v703_v34  ;;  %v3678_v11 = vpack.c.bf16 %v736_v39, %v735_v36  ;;  %v737_v43 = vld [vmem:[%s3911_s4 + $0x550] sm:$0xff]  ;;  %v738_v34 = vld [vmem:[%s3911_s4 + $0x558] sm:$0xff]  ;;  %v723_v36 = vld [vmem:[%s3911_s4 + $0x4e0] sm:$0xff] }
  0xb3   :  { %2245 = vmatprep.subr.bf16.mxu0 %v3616_v42  ;;  %2277 = vmatprep.subr.bf16.mxu1 %v3618_v24  ;;  %v705_v24 = vld [vmem:[%s3911_s4 + $0x450] sm:$0xff]  ;;  %v706_v42 = vld [vmem:[%s3911_s4 + $0x458] sm:$0xff]  ;;  %v3688_v5 = vpack.c.bf16 %v722_v13, %v721_v40  ;;  %v724_v39 = vld [vmem:[%s3911_s4 + $0x4e8] sm:$0xff] }
  0xb4   :  { %4051 = vst [vmem:[#allocation63_spill] sm:$0xff] %v3654_v6  ;;  %4052 = vst [vmem:[#allocation64_spill] sm:$0xff] %v3676_v22  ;;  %v755_v40 = vld [vmem:[%s3911_s4 + $0x5e0] sm:$0xff]  ;;  %v756_v13 = vld [vmem:[%s3911_s4 + $0x5e8] sm:$0xff] }
  0xb5   :  { %4053 = vst [vmem:[#allocation65_spill] sm:$0xff] %v3678_v11  ;;  %4054 = vst [vmem:[#allocation66_spill] sm:$0xff] %v3688_v5 }
  0xb6   :  { %2247 = vmatpush3.bf16.msra.mxu0 %v3640_v47  ;;  %2279 = vmatpush3.bf16.msra.mxu1 %v3642_v59  ;;  %v3690_v47 = vpack.c.bf16 %v754_v18, %v753_v38  ;;  %v3712_v38 = vpack.c.bf16 %v706_v42, %v705_v24  ;;  %v3714_v18 = vpack.c.bf16 %v738_v34, %v737_v43  ;;  %v739_v42 = vld [vmem:[%s3911_s4 + $0x560] sm:$0xff]  ;;  %v740_v24 = vld [vmem:[%s3911_s4 + $0x568] sm:$0xff]  ;;  %v725_v43 = vld [vmem:[%s3911_s4 + $0x4f0] sm:$0xff] }
  0xb7   :  { %2249 = vmatprep.subr.bf16.mxu0 %v3652_v9  ;;  %2281 = vmatprep.subr.bf16.mxu1 %v3654_v6  ;;  %v707_v6 = vld [vmem:[%s3911_s4 + $0x460] sm:$0xff]  ;;  %v708_v9 = vld [vmem:[%s3911_s4 + $0x468] sm:$0xff]  ;;  %v3724_v59 = vpack.c.bf16 %v724_v39, %v723_v36  ;;  %v726_v34 = vld [vmem:[%s3911_s4 + $0x4f8] sm:$0xff] }
  0xb8   :  { %4055 = vst [vmem:[#allocation67_spill] sm:$0xff] %v3690_v47  ;;  %4056 = vst [vmem:[#allocation68_spill] sm:$0xff] %v3712_v38  ;;  %v757_v36 = vld [vmem:[%s3911_s4 + $0x5f0] sm:$0xff]  ;;  %v758_v39 = vld [vmem:[%s3911_s4 + $0x5f8] sm:$0xff] }
  0xba   :  { %2251 = vmatpush3.bf16.msra.mxu0 %v3676_v22  ;;  %2283 = vmatpush3.bf16.msra.mxu1 %v3678_v11  ;;  %v3726_v22 = vpack.c.bf16 %v756_v13, %v755_v40  ;;  %v3748_v40 = vpack.c.bf16 %v708_v9, %v707_v6  ;;  %v3750_v13 = vpack.c.bf16 %v740_v24, %v739_v42  ;;  %v741_v9 = vld [vmem:[%s3911_s4 + $0x570] sm:$0xff]  ;;  %v742_v6 = vld [vmem:[%s3911_s4 + $0x578] sm:$0xff] }
  0xbb   :  { %2253 = vmatprep.subr.bf16.mxu0 %v3688_v5  ;;  %2285 = vmatprep.subr.bf16.mxu1 %v3690_v47  ;;  %v709_v47 = vld [vmem:[%s3911_s4 + $0x470] sm:$0xff]  ;;  %v3757_v5 = vpack.c.bf16 %v726_v34, %v725_v43  ;;  %v3762_v11 = vpack.c.bf16 %v758_v39, %v757_v36  ;;  %v3774_v24 = vpack.c.bf16 %v742_v6, %v741_v9  ;;  %v4069_v36 = vld [vmem:[#allocation14_spill] sm:$0xff]  ;;  %v4070_v39 = vld [vmem:[#allocation15_spill] sm:$0xff] }
  0xbc   :  { %v809_v43 = vrot.slane %v3518_v31, %v3094_v23  ;;  %v817_v34 = vrot.slane %v3518_v31, %v3100_v63  ;;  %v4060_v63 = vld [vmem:[#allocation6_spill] sm:$0xff]  ;;  %v4068_v31 = vld [vmem:[#allocation13_spill] sm:$0xff]  ;;  %v4071_v9 = vld [vmem:[#allocation16_spill] sm:$0xff] }
  0xbd   :  { %v4072_v6 = vld [vmem:[#allocation17_spill] sm:$0xff] }
  0xbe   :  { %2255 = vmatpush3.bf16.msra.mxu0 %v3712_v38  ;;  %2287 = vmatpush3.bf16.msra.mxu1 %v3714_v18  ;;  %v710_v38 = vld [vmem:[%s3911_s4 + $0x478] sm:$0xff] }
  0xbf   :  { %2257 = vmatprep.subr.bf16.mxu0 %v3724_v59  ;;  %2289 = vmatprep.subr.bf16.mxu1 %v3726_v22  ;;  %v3772_v42 = vpack.c.bf16 %v710_v38, %v709_v47  ;;  %v760_v47 = vmul.f32 %v3113_v54, %v2885_v27  ;;  %v762_v38 = vmul.f32 %v3119_v56, %v2889_v30  ;;  %v4059_v27 = vld [vmem:[#allocation4_spill] sm:$0xff]  ;;  %v4061_v30 = vld [vmem:[#allocation5_spill] sm:$0xff]  ;;  %v4062_v54 = vld [vmem:[#allocation7_spill] sm:$0xff] }
  0xc0   :  { %v4067_v56 = vld [vmem:[#allocation12_spill] sm:$0xff] }
  0xc2   :  { %2259 = vmatpush3.bf16.msra.mxu0 %v3748_v40  ;;  %2291 = vmatpush3.bf16.msra.mxu1 %v3750_v13 }
  0xc3   :  { %2261 = vmatprep.subr.bf16.mxu0 %v3757_v5  ;;  %2293 = vmatprep.subr.bf16.mxu1 %v3762_v11 }
  0xc6   :  { %2263 = vmatpush3.bf16.msra.mxu0 %v3772_v42  ;;  %2295 = vmatpush3.bf16.msra.mxu1 %v3774_v24 }
  0xc7   :  { %2297 = vmatprep.subr.bf16.mxu0 %v2558_v3  ;;  %2329 = vmatprep.subr.bf16.mxu1 %v2571_v8  ;;  %v4057_v3 = vld [vmem:[#allocation2_spill] sm:$0xff]  ;;  %v4058_v8 = vld [vmem:[#allocation3_spill] sm:$0xff] }
  0xc9   :  { %1179 = vmatmul.mubr.f32.vlgmr.msra.gmra.mrb[4].mxu0 %v809_v43  ;;  %1249 = vmatmul.mubr.f32.vlgmr.msra.gmra.mrb[4].mxu1 %v817_v34  ;;  %v4073_v43 = vld [vmem:[#allocation18_spill] sm:$0xff]  ;;  %v4074_v34 = vld [vmem:[#allocation19_spill] sm:$0xff] }
  0xca   :  { %2299 = vmatpush3.bf16.msra.mxu0 %v2569_v7  ;;  %2331 = vmatpush3.bf16.msra.mxu1 %v2583_v12  ;;  %v4063_v7 = vld [vmem:[#allocation8_spill] sm:$0xff]  ;;  %v4064_v12 = vld [vmem:[#allocation9_spill] sm:$0xff] }
  0xcb   :  { %2301 = vmatprep.subr.bf16.mxu0 %v2596_v16  ;;  %2333 = vmatprep.subr.bf16.mxu1 %v2610_v21  ;;  %v4065_v16 = vld [vmem:[#allocation10_spill] sm:$0xff]  ;;  %v4066_v21 = vld [vmem:[#allocation11_spill] sm:$0xff] }
  0xcc   :  { %1322 = vmatprep.mubr.f32.mxu0 %v760_v47  ;;  %1392 = vmatprep.mubr.f32.mxu1 %v762_v38  ;;  %v4075_v47 = vld [vmem:[#allocation20_spill] sm:$0xff]  ;;  %v4076_v38 = vld [vmem:[#allocation21_spill] sm:$0xff] }
  0xce   :  { %2303 = vmatpush3.bf16.msra.mxu0 %v4057_v3  ;;  %2335 = vmatpush3.bf16.msra.mxu1 %v4058_v8  ;;  %v4077_v3 = vld [vmem:[#allocation22_spill] sm:$0xff]  ;;  %v4078_v8 = vld [vmem:[#allocation23_spill] sm:$0xff] }
  0xcf   :  { %2305 = vmatprep.subr.bf16.mxu0 %v4059_v27  ;;  %2337 = vmatprep.subr.bf16.mxu1 %v4060_v63  ;;  %v4079_v27 = vld [vmem:[#allocation24_spill] sm:$0xff]  ;;  %v4080_v63 = vld [vmem:[#allocation25_spill] sm:$0xff] }
  0xd2   :  { %2307 = vmatpush3.bf16.msra.mxu0 %v4061_v30  ;;  %2339 = vmatpush3.bf16.msra.mxu1 %v4062_v54  ;;  %v4081_v30 = vld [vmem:[#allocation28_spill] sm:$0xff] }
  0xd3   :  { %2309 = vmatprep.subr.bf16.mxu0 %v4063_v7  ;;  %2341 = vmatprep.subr.bf16.mxu1 %v4064_v12  ;;  %v759_v54 = vmul.f32 %v3110_v14, %v4081_v30  ;;  %v4082_v7 = vld [vmem:[#allocation29_spill] sm:$0xff]  ;;  %v4089_v14 = vld [vmem:[#allocation46_spill] sm:$0xff] }
  0xd4   :  { %v761_v12 = vmul.f32 %v3116_v55, %v4082_v7  ;;  %v4090_v55 = vld [vmem:[#allocation47_spill] sm:$0xff] }
  0xd6   :  { %2311 = vmatpush3.bf16.msra.mxu0 %v4065_v16  ;;  %2343 = vmatpush3.bf16.msra.mxu1 %v4066_v21  ;;  %v4083_v16 = vld [vmem:[#allocation26_spill] sm:$0xff]  ;;  %v4084_v21 = vld [vmem:[#allocation27_spill] sm:$0xff] }
  0xd7   :  { %2313 = vmatprep.subr.bf16.mxu0 %v4067_v56  ;;  %2345 = vmatprep.subr.bf16.mxu1 %v4068_v31  ;;  %v4085_v56 = vld [vmem:[#allocation31_spill] sm:$0xff] }
  0xd8   :  { %v764_v31 = vmul.f32 %v3127_v29, %v4085_v56  ;;  %v4091_v29 = vld [vmem:[#allocation48_spill] sm:$0xff] }
  0xda   :  { %2315 = vmatpush3.bf16.msra.mxu0 %v4069_v36  ;;  %2347 = vmatpush3.bf16.msra.mxu1 %v4070_v39  ;;  %v4086_v36 = vld [vmem:[#allocation33_spill] sm:$0xff] }
  0xdb   :  { %2317 = vmatprep.subr.bf16.mxu0 %v4071_v9  ;;  %2349 = vmatprep.subr.bf16.mxu1 %v4072_v6  ;;  %v766_v39 = vmul.f32 %v3135_v37, %v4086_v36  ;;  %v4092_v37 = vld [vmem:[#allocation49_spill] sm:$0xff]  ;;  %v4117_v9 = vld [vmem:[#allocation66_spill] sm:$0xff]  ;;  %v4118_v6 = vld [vmem:[#allocation67_spill] sm:$0xff] }
  0xde   :  { %2319 = vmatpush3.bf16.msra.mxu0 %v4073_v43  ;;  %2351 = vmatpush3.bf16.msra.mxu1 %v4074_v34  ;;  %v4119_v43 = vld [vmem:[#allocation68_spill] sm:$0xff]  ;;  %v4120_v34 = vld [vmem:[#allocation34_spill] sm:$0xff] }
  0xdf   :  { %2321 = vmatprep.subr.bf16.mxu0 %v4075_v47  ;;  %2353 = vmatprep.subr.bf16.mxu1 %v4076_v38  ;;  %v4121_v47 = vld [vmem:[#allocation41_spill] sm:$0xff] }
  0xe0   :  { %v767_v38 = vmul.f32 %v4121_v47, %v4120_v34 }
  0xe2   :  { %2323 = vmatpush3.bf16.msra.mxu0 %v4077_v3  ;;  %2355 = vmatpush3.bf16.msra.mxu1 %v4078_v8  ;;  %v4122_v3 = vld [vmem:[#allocation36_spill] sm:$0xff]  ;;  %v4123_v8 = vld [vmem:[#allocation42_spill] sm:$0xff] }
  0xe3   :  { %2325 = vmatprep.subr.bf16.mxu0 %v4079_v27  ;;  %2357 = vmatprep.subr.bf16.mxu1 %v4080_v63  ;;  %v769_v27 = vmul.f32 %v4123_v8, %v4122_v3 }
  0xe6   :  { %2327 = vmatpush3.bf16.msra.mxu0 %v4083_v16  ;;  %2359 = vmatpush3.bf16.msra.mxu1 %v4084_v21 }
  0xe7   :  { %2361 = vmatprep.subr.bf16.mxu0 %v3057_v26  ;;  %2393 = vmatprep.subr.bf16.mxu1 %v3072_v4  ;;  %v4087_v26 = vld [vmem:[#allocation44_spill] sm:$0xff]  ;;  %v4088_v4 = vld [vmem:[#allocation45_spill] sm:$0xff] }
  0xe9   :  { %1323 = vmatmul.mubr.f32.vlgmr.msra.gmra.mrb[6].mxu0 %v759_v54  ;;  %1393 = vmatmul.mubr.f32.vlgmr.msra.gmra.mrb[6].mxu1 %v761_v12 }
  0xea   :  { %2363 = vmatpush3.bf16.msra.mxu0 %v3194_v53  ;;  %2395 = vmatpush3.bf16.msra.mxu1 %v3196_v49  ;;  %v4093_v53 = vld [vmem:[#allocation50_spill] sm:$0xff] }
  0xeb   :  { %2365 = vmatprep.subr.bf16.mxu0 %v3212_v60  ;;  %2397 = vmatprep.subr.bf16.mxu1 %v3214_v57  ;;  %v4094_v49 = vld [vmem:[#allocation30_spill] sm:$0xff] }
  0xec   :  { %1462 = vmatprep.mubr.f32.mxu0 %v764_v31  ;;  %1532 = vmatprep.mubr.f32.mxu1 %v766_v39  ;;  %v4095_v60 = vld [vmem:[#allocation38_spill] sm:$0xff] }
  0xed   :  { %v763_v57 = vmul.f32 %v4095_v60, %v4094_v49 }
  0xee   :  { %2367 = vmatpush3.bf16.msra.mxu0 %v3242_v2  ;;  %2399 = vmatpush3.bf16.msra.mxu1 %v3244_v45  ;;  %v4096_v2 = vld [vmem:[#allocation32_spill] sm:$0xff]  ;;  %v4097_v45 = vld [vmem:[#allocation39_spill] sm:$0xff] }
  0xef   :  { %2369 = vmatprep.subr.bf16.mxu0 %v3257_v48  ;;  %2401 = vmatprep.subr.bf16.mxu1 %v3259_v32  ;;  %v765_v48 = vmul.f32 %v4097_v45, %v4096_v2  ;;  %v4098_v32 = vld [vmem:[#allocation51_spill] sm:$0xff] }
  0xf2   :  { %2371 = vmatpush3.bf16.msra.mxu0 %v3290_v44  ;;  %2403 = vmatpush3.bf16.msra.mxu1 %v3292_v19  ;;  %v4099_v44 = vld [vmem:[#allocation35_spill] sm:$0xff]  ;;  %v4100_v19 = vld [vmem:[#allocation40_spill] sm:$0xff] }
  0xf3   :  { %2373 = vmatprep.subr.bf16.mxu0 %v3302_v0  ;;  %2405 = vmatprep.subr.bf16.mxu1 %v3304_v62  ;;  %v768_v0 = vmul.f32 %v4100_v19, %v4099_v44  ;;  %v4101_v62 = vld [vmem:[#allocation37_spill] sm:$0xff] }
  0xf6   :  { %2375 = vmatpush3.bf16.msra.mxu0 %v3334_v28  ;;  %2407 = vmatpush3.bf16.msra.mxu1 %v3336_v20  ;;  %v4102_v28 = vld [vmem:[#allocation43_spill] sm:$0xff] }
  0xf7   :  { %2377 = vmatprep.subr.bf16.mxu0 %v3346_v1  ;;  %2409 = vmatprep.subr.bf16.mxu1 %v3348_v52  ;;  %v770_v20 = vmul.f32 %v4102_v28, %v4101_v62  ;;  %v4105_v1 = vld [vmem:[#allocation54_spill] sm:$0xff]  ;;  %v4106_v52 = vld [vmem:[#allocation55_spill] sm:$0xff] }
  0xfa   :  { %2379 = vmatpush3.bf16.msra.mxu0 %v3370_v17  ;;  %2411 = vmatpush3.bf16.msra.mxu1 %v3372_v15  ;;  %v4107_v17 = vld [vmem:[#allocation56_spill] sm:$0xff]  ;;  %v4108_v15 = vld [vmem:[#allocation57_spill] sm:$0xff] }
  0xfb   :  { %2381 = vmatprep.subr.bf16.mxu0 %v3382_v25  ;;  %2413 = vmatprep.subr.bf16.mxu1 %v3384_v41  ;;  %v4109_v25 = vld [vmem:[#allocation58_spill] sm:$0xff]  ;;  %v4110_v41 = vld [vmem:[#allocation59_spill] sm:$0xff] }
  0xfe   :  { %2383 = vmatpush3.bf16.msra.mxu0 %v3408_v33  ;;  %2415 = vmatpush3.bf16.msra.mxu1 %v4087_v26  ;;  %v4111_v33 = vld [vmem:[#allocation60_spill] sm:$0xff] }
  0xff   :  { %2385 = vmatprep.subr.bf16.mxu0 %v4088_v4  ;;  %2417 = vmatprep.subr.bf16.mxu1 %v4089_v14 }
 0x102   :  { %2387 = vmatpush3.bf16.msra.mxu0 %v4090_v55  ;;  %2419 = vmatpush3.bf16.msra.mxu1 %v4091_v29 }
 0x103   :  { %2389 = vmatprep.subr.bf16.mxu0 %v4092_v37  ;;  %2421 = vmatprep.subr.bf16.mxu1 %v4093_v53 }
 0x106   :  { %2391 = vmatpush3.bf16.msra.mxu0 %v3484_v10  ;;  %2423 = vmatpush3.bf16.msra.mxu1 %v3486_v61  ;;  %v4103_v10 = vld [vmem:[#allocation52_spill] sm:$0xff]  ;;  %v4104_v61 = vld [vmem:[#allocation53_spill] sm:$0xff] }
 0x107   :  { %2425 = vmatprep.subr.bf16.mxu0 %v3496_v46  ;;  %2457 = vmatprep.subr.bf16.mxu1 %v4098_v32  ;;  %v4114_v46 = vld [vmem:[#allocation63_spill] sm:$0xff] }
 0x109   :  { %1463 = vmatmul.mubr.f32.vlgmr.msra.gmra.mrb[8].mxu0 %v763_v57  ;;  %1533 = vmatmul.mubr.f32.vlgmr.msra.gmra.mrb[8].mxu1 %v765_v48 }
 0x10a   :  { %2427 = vmatpush3.bf16.msra.mxu0 %v3528_v50  ;;  %2459 = vmatpush3.bf16.msra.mxu1 %v3530_v51  ;;  %v4112_v51 = vld [vmem:[#allocation61_spill] sm:$0xff]  ;;  %v4113_v50 = vld [vmem:[#allocation62_spill] sm:$0xff] }
 0x10b   :  { %2429 = vmatprep.subr.bf16.mxu0 %v3540_v58  ;;  %2461 = vmatprep.subr.bf16.mxu1 %v4103_v10  ;;  %v4115_v58 = vld [vmem:[#allocation64_spill] sm:$0xff] }
 0x10c   :  { %1602 = vmatprep.mubr.f32.mxu0 %v768_v0  ;;  %1672 = vmatprep.mubr.f32.mxu1 %v770_v20 }
 0x10e   :  { %2431 = vmatpush3.bf16.msra.mxu0 %v3568_v35  ;;  %2463 = vmatpush3.bf16.msra.mxu1 %v4104_v61  ;;  %v4116_v35 = vld [vmem:[#allocation65_spill] sm:$0xff] }
 0x10f   :  { %2433 = vmatprep.subr.bf16.mxu0 %v4105_v1  ;;  %2465 = vmatprep.subr.bf16.mxu1 %v4106_v52 }
 0x112   :  { %2435 = vmatpush3.bf16.msra.mxu0 %v4107_v17  ;;  %2467 = vmatpush3.bf16.msra.mxu1 %v4108_v15 }
 0x113   :  { %2437 = vmatprep.subr.bf16.mxu0 %v4109_v25  ;;  %2469 = vmatprep.subr.bf16.mxu1 %v4110_v41 }
 0x116   :  { %2439 = vmatpush3.bf16.msra.mxu0 %v4111_v33  ;;  %2471 = vmatpush3.bf16.msra.mxu1 %v4112_v51 }
 0x117   :  { %2441 = vmatprep.subr.bf16.mxu0 %v4113_v50  ;;  %2473 = vmatprep.subr.bf16.mxu1 %v4114_v46 }
 0x11a   :  { %2443 = vmatpush3.bf16.msra.mxu0 %v4115_v58  ;;  %2475 = vmatpush3.bf16.msra.mxu1 %v4116_v35 }
 0x11b   :  { %2445 = vmatprep.subr.bf16.mxu0 %v4117_v9  ;;  %2477 = vmatprep.subr.bf16.mxu1 %v4118_v6 }
 0x11e   :  { %2447 = vmatpush3.bf16.msra.mxu0 %v4119_v43  ;;  %2479 = vmatpush3.bf16.msra.mxu1 %v3714_v18 }
 0x11f   :  { %2449 = vmatprep.subr.bf16.mxu0 %v3724_v59  ;;  %2481 = vmatprep.subr.bf16.mxu1 %v3726_v22 }
 0x122   :  { %2451 = vmatpush3.bf16.msra.mxu0 %v3748_v40  ;;  %2483 = vmatpush3.bf16.msra.mxu1 %v3750_v13 }
 0x123   :  { %2453 = vmatprep.subr.bf16.mxu0 %v3757_v5  ;;  %2485 = vmatprep.subr.bf16.mxu1 %v3762_v11  ;;  %v771_v5 = vld [vmem:[%s3916_s5] sm:$0x1] }
 0x126   :  { %2455 = vmatpush3.bf16.msra.mxu0 %v3772_v42  ;;  %2487 = vmatpush3.bf16.msra.mxu1 %v3774_v24 }
 0x129   :  { %1603 = vmatmul.mubr.f32.vlgmr.msra.gmra.mrb[10].mxu0 %v767_v38  ;;  %1673 = vmatmul.mubr.f32.vlgmr.msra.gmra.mrb[10].mxu1 %v769_v27 }
 0x15c   :  { %v1716_v59 = vpop.f32.mrb[0].mxu0  ;;  %v1751_v22 = vpop.f32.mrb[0].mxu1 }
 0x15d   :  { %v1717_v18 = vpop.f32.mrb[1].mxu0  ;;  %v1752_v11 = vpop.f32.mrb[1].mxu1 }
 0x15e   :  { %v1718_v40 = vadd.f32 %v1717_v18, %v1716_v59  ;;  %v1753_v13 = vadd.f32 %v1752_v11, %v1751_v22 }
 0x160   :  { %v901_v63 = vadd.f32 %v1718_v40, %v771_v5 }
 0x162   :  { %v971_v30 = vadd.f32 %v1753_v13, %v901_v63 }
 0x17c   :  { %v1786_v54 = vpop.f32.mrb[2].mxu0  ;;  %v1821_v7 = vpop.f32.mrb[2].mxu1 }
 0x17d   :  { %v1787_v12 = vpop.f32.mrb[3].mxu0  ;;  %v1822_v42 = vpop.f32.mrb[3].mxu1 }
 0x17e   :  { %v1788_v16 = vadd.f32 %v1787_v12, %v1786_v54  ;;  %v1823_v24 = vadd.f32 %v1822_v42, %v1821_v7 }
 0x180   :  { %v1041_v21 = vadd.f32 %v1788_v16, %v971_v30 }
 0x182   :  { %v1111_v56 = vadd.f32 %v1823_v24, %v1041_v21 }
 0x19c   :  { %v1856_v31 = vpop.f32.mrb[4].mxu0  ;;  %v1891_v36 = vpop.f32.mrb[4].mxu1 }
 0x19d   :  { %v1857_v39 = vpop.f32.mrb[5].mxu0  ;;  %v1892_v26 = vpop.f32.mrb[5].mxu1 }
 0x19e   :  { %v1858_v4 = vadd.f32 %v1857_v39, %v1856_v31  ;;  %v1893_v14 = vadd.f32 %v1892_v26, %v1891_v36 }
 0x1a0   :  { %v1181_v55 = vadd.f32 %v1858_v4, %v1111_v56 }
 0x1a2   :  { %v1251_v29 = vadd.f32 %v1893_v14, %v1181_v55 }
 0x1a4   :  { %v1257_v57 = vrot.slane %v1251_v29, %v3094_v23 }
 0x1bc   :  { %v1926_v37 = vpop.f32.mrb[6].mxu0  ;;  %v1961_v53 = vpop.f32.mrb[6].mxu1 }
 0x1bd   :  { %v1927_v49 = vpop.f32.mrb[7].mxu0  ;;  %v1962_v60 = vpop.f32.mrb[7].mxu1 }
 0x1be   :  { %v1928_v2 = vadd.f32 %v1927_v49, %v1926_v37  ;;  %v1963_v45 = vadd.f32 %v1962_v60, %v1961_v53 }
 0x1c0   :  { %v1325_v48 = vadd.f32 %v1928_v2, %v1257_v57 }
 0x1c2   :  { %v1395_v32 = vadd.f32 %v1963_v45, %v1325_v48 }
 0x1dc   :  { %v1996_v44 = vpop.f32.mrb[8].mxu0  ;;  %v2031_v19 = vpop.f32.mrb[8].mxu1 }
 0x1dd   :  { %v1997_v0 = vpop.f32.mrb[9].mxu0  ;;  %v2032_v62 = vpop.f32.mrb[9].mxu1 }
 0x1de   :  { %v1998_v28 = vadd.f32 %v1997_v0, %v1996_v44  ;;  %v2033_v20 = vadd.f32 %v2032_v62, %v2031_v19 }
 0x1e0   :  { %v1465_v10 = vadd.f32 %v1998_v28, %v1395_v32 }
 0x1e2   :  { %v1535_v61 = vadd.f32 %v2033_v20, %v1465_v10 }
 0x1fc   :  { %v2066_v1 = vpop.f32.mrb[10].mxu0  ;;  %v2101_v52 = vpop.f32.mrb[10].mxu1 }
 0x1fd   :  { %v2067_v17 = vpop.f32.mrb[11].mxu0  ;;  %v2102_v15 = vpop.f32.mrb[11].mxu1 }
 0x1fe   :  { %v2068_v25 = vadd.f32 %v2067_v17, %v2066_v1  ;;  %v2103_v41 = vadd.f32 %v2102_v15, %v2101_v52 }
 0x200   :  { %v1605_v33 = vadd.f32 %v2068_v25, %v1535_v61 }
 0x202   :  { %v1675_v23 = vadd.f32 %v2103_v41, %v1605_v33 }
 0x204   :  { %1679 = vst.msk [vmem:[%s3917_s6] sm:$0xff] %vm1678_vm0, %v1675_v23 }

</bundles_post_ra>
